<compile_context>
chip_gen: v7x
topology: tpu7x:2x2x1
jax: 0.10.0
libtpu: 0.0.40
codegen_flags: <defaults>
</compile_context>

<pallas_src>
import math

import jax
import jax.numpy as jnp
from jax import lax
from jax.experimental import pallas as pl
from jax.experimental.pallas import tpu as pltpu

# Registered buffers of the torch module -- deterministic constants.
LS1 = 1.0
OS1 = 1.0
LS2 = 1.0
OS2 = 1.0
LS3 = 1.0
OS3 = 1.0
NOISE = 0.2
WIDTH = 2
JITTER = 1e-4          # eye.mul(0.0001) added to both covariances
_PIVOT_FLOOR = 1e-20   # guards lax.rsqrt against a non-positive pivot

# Contract the LAST dim of both 2-D operands: A @ B^T on the MXU.
_NT_DIMS = (((1,), (1,)), ((), ()))
# Batched (leading batch dim) A @ B^T: the 'bqd,bkd->bqk' flash pattern.
_BATCHED_NT_DIMS = (((2,), (2,)), ((0,), (0,)))


def _batched_cholesky_in_place(a_ref):
    """Batched in-place lower Cholesky of (B, n, n) SPD matrices in VMEM.

    Right-looking, one pivot per (statically unrolled) step.  The pivot
    row/column/pivot are read back from the scratch with static slices (no
    O(n^2) masked reductions per step); the symmetric trailing Schur
    complement provides the column for free.  On exit `a_ref` holds L with an
    exactly-zero strict upper triangle (each column k is overwritten with
    `where(i >= k, L[:, k], 0)`), so no final triangular mask is needed.

    TODO(synk): for large n, switch to lax.fori_loop and a blocked panel
    factorization whose trailing update is one MXU dot per panel.
    """
    _, n, _ = a_ref.shape
    ivec = lax.broadcasted_iota(jnp.int32, (n, 1), 0)   # row index (sublanes)
    jvec = lax.broadcasted_iota(jnp.int32, (1, n), 1)   # col index (lanes)
    jj = lax.broadcasted_iota(jnp.int32, (n, n), 1)
    for k in range(n):
        row = a_ref[:, k:k + 1, :]                      # (B, 1, n)  A[k, :]
        col = a_ref[:, :, k:k + 1]                      # (B, n, 1)  A[:, k]
        pivot = a_ref[:, k:k + 1, k:k + 1]              # (B, 1, 1)  A[k, k]
        # TODO(synk): psd_safe_cholesky's jitter-retry is not ported; the
        # floor only prevents rsqrt(<=0) -> NaN for degenerate inputs.
        inv = lax.rsqrt(jnp.maximum(pivot, jnp.float32(_PIVOT_FLOOR)))   # EUP
        lcol = col * inv                                # column k of L
        # Rank-1 Schur update, masked through the small factors only.
        lcol_m = jnp.where(ivec > k, lcol, 0.0)         # rows  > k
        lrow_m = jnp.where(jvec > k, row * inv, 0.0)    # cols  > k
        colvals = jnp.where(ivec >= k, lcol, 0.0)       # final L[:, k]
        a_ref[...] = jnp.where(jj == k, colvals,
                               a_ref[...] - lcol_m * lrow_m)


def _layer1_chol_kernel(x_ref, xt_ref, l1_ref, a_ref):
    """Hidden-layer RBF covariance + Cholesky (sample-invariant, runs once)."""
    n, _ = x_ref.shape
    inv_ls1 = jnp.float32(1.0 / LS1)
    xs = x_ref[...] * inv_ls1                           # (n, d)
    xst = xt_ref[...] * inv_ls1                         # (d, n)
    # ||x_i||^2 in both orientations straight from the inputs (exact, VPU);
    # no (n, n) masked diagonal reductions.
    sq_col = jnp.sum(xs * xs, axis=1, keepdims=True)    # (n, 1)
    sq_row = jnp.sum(xst * xst, axis=0, keepdims=True)  # (1, n)
    gram = lax.dot_general(xs, xs, _NT_DIMS,
                           preferred_element_type=jnp.float32)       # (n, n)
    dist = jnp.maximum(sq_col + sq_row - 2.0 * gram, 0.0)
    ii = lax.broadcasted_iota(jnp.int32, (n, n), 0)
    jj = lax.broadcasted_iota(jnp.int32, (n, n), 1)
    cov = jnp.exp(dist * -0.5) * OS1 + jnp.where(
        ii == jj, jnp.float32(JITTER), jnp.float32(0.0))
    a_ref[...] = cov[None]                              # (1, n, n)
    _batched_cholesky_in_place(a_ref)
    l1_ref[...] = a_ref[0]


def _sample_block_kernel(l1_ref, hf_ref, ff_ref, out_ref, a_ref):
    """Layers 2+3 for a block of `spb` HMC samples (one grid step)."""
    spb, width, n = hf_ref.shape
    ii = lax.broadcasted_iota(jnp.int32, (n, n), 0)
    jj = lax.broadcasted_iota(jnp.int32, (n, n), 1)

    # ---- unwhiten hidden fns: ONE batched MXU matmul ------------------------
    l1b = jnp.broadcast_to(l1_ref[...], (spb, n, n))
    # uc[s, i, w] = sum_j L1[i, j] * hf[s, w, j]   (column-oriented)
    uc = lax.dot_general(l1b, hf_ref[...], _BATCHED_NT_DIMS,
                         preferred_element_type=jnp.float32)      # (spb, n, w)
    uc = uc * jnp.float32(1.0 / LS2)

    # ---- additive 2-layer kernel --------------------------------------------
    # Per hidden unit w, pairwise squared distances via the MXU identity
    #   d_ij = v_i^2 + v_j^2 - 2 v_i v_j   (augmented operands), so no
    # in-kernel transpose and no second unwhitening matmul are required.
    ones_c = jnp.ones((spb, n, 1), jnp.float32)
    acc = jnp.zeros((spb, n, n), jnp.float32)
    for w in range(width):                              # width == 2, static
        v = uc[:, :, w:w + 1]                           # (spb, n, 1)
        v2 = v * v
        lhs = jnp.concatenate([v * -2.0, v2, ones_c], axis=-1)    # (spb, n, 3)
        rhs = jnp.concatenate([v, ones_c, v2], axis=-1)           # (spb, n, 3)
        d_w = jnp.maximum(
            lax.dot_general(lhs, rhs, _BATCHED_NT_DIMS,
                            preferred_element_type=jnp.float32), 0.0)
        acc = acc + jnp.exp(d_w * -0.5) * OS2
    kern = acc * jnp.float32(1.0 / width)
    # lax.rsqrt (EUP slot) instead of sqrt-then-divide; the argument is
    # >= LS3^2 so it is well conditioned and matches torch within tolerance.
    fcov = (OS3 * LS3) * lax.rsqrt((OS2 - kern) * 2.0 + LS3 * LS3)
    fcov = fcov + jnp.where(ii == jj, jnp.float32(JITTER), jnp.float32(0.0))

    # ---- batched Cholesky in VMEM scratch -----------------------------------
    a_ref[...] = fcov
    _batched_cholesky_in_place(a_ref)
    l2 = a_ref[...]                                     # (spb, n, n), lower

    # ---- unwhiten final fns; emit ONE lane-dense (1, spb*n) latent row ------
    ff = ff_ref[...]                                    # (spb, 1, n)
    rows = []
    for s in range(spb):                                # static unroll
        # lat[0, i] = sum_j L2[s, i, j] * ff[s, 0, j]
        rows.append(lax.dot_general(ff[s], l2[s], _NT_DIMS,
                                    preferred_element_type=jnp.float32))
    out_ref[...] = jnp.concatenate(rows, axis=-1)[None]   # (1, 1, spb*n)


def deep_gp_3l2l_forward(inputs, hidden_fns_whitened, final_fns_whitened):
    """DeepGP3L2L_HMC.forward, train_x == inputs branch, batched over samples.

    Args:
      inputs:              (N, D) training inputs.
      hidden_fns_whitened: (S, WIDTH, N) or (WIDTH, N) whitened 'hidden_fns'.
      final_fns_whitened:  (S, 1, N) or (1, N) whitened 'final_fns'.
    Returns:
      (mean, scale) of the output Normal: mean is (S, N) (or (N,) when the
      whitened draws were unbatched) and scale = sqrt(noise).
    """
    n, d = inputs.shape
    squeeze_out = hidden_fns_whitened.ndim == 2
    hfw = hidden_fns_whitened[None] if squeeze_out else hidden_fns_whitened
    ffw = (final_fns_whitened[None] if final_fns_whitened.ndim == 2
           else final_fns_whitened)
    s, width, _ = hfw.shape
    assert ffw.shape == (s, 1, n)
    inputs = inputs.astype(jnp.float32)
    hfw = hfw.astype(jnp.float32)
    ffw = ffw.astype(jnp.float32)

    # ---- layer 1 (sample-invariant): computed exactly once ------------------
    l1 = pl.pallas_call(
        _layer1_chol_kernel,
        out_shape=jax.ShapeDtypeStruct((n, n), jnp.float32),
        grid=(1,),
        in_specs=[pl.BlockSpec((n, d), lambda i: (0, 0)),
                  pl.BlockSpec((d, n), lambda i: (0, 0))],
        out_specs=pl.BlockSpec((n, n), lambda i: (0, 0)),
        scratch_shapes=[pltpu.VMEM((1, n, n), jnp.float32)],
        compiler_params=pltpu.CompilerParams(
            dimension_semantics=("arbitrary",)),
        cost_estimate=pl.CostEstimate(
            flops=2 * n * n * d + n ** 3,
            transcendentals=n * n + n,
            bytes_accessed=4 * (2 * n * d + n * n)),
    )(inputs, inputs.T)          # wrapper-side transpose: layout plumbing only

    # ---- layers 2+3, batched over HMC samples -------------------------------
    # Pack samples so each grid step emits a ~128-lane latent row.
    spb = 1 if n >= 128 else max(1, min(s, 128 // n))
    s_pad = pl.cdiv(s, spb) * spb
    if s_pad != s:
        hfw = jnp.concatenate(
            [hfw, jnp.zeros((s_pad - s, width, n), jnp.float32)], axis=0)
        ffw = jnp.concatenate(
            [ffw, jnp.zeros((s_pad - s, 1, n), jnp.float32)], axis=0)
    nb = s_pad // spb

    out = pl.pallas_call(
        _sample_block_kernel,
        out_shape=jax.ShapeDtypeStruct((nb, 1, spb * n), jnp.float32),
        grid=(nb,),
        in_specs=[pl.BlockSpec((n, n), lambda b: (0, 0)),
                  pl.BlockSpec((spb, width, n), lambda b: (b, 0, 0)),
                  pl.BlockSpec((spb, 1, n), lambda b: (b, 0, 0))],
        out_specs=pl.BlockSpec((1, 1, spb * n), lambda b: (b, 0, 0)),
        scratch_shapes=[pltpu.VMEM((spb, n, n), jnp.float32)],
        compiler_params=pltpu.CompilerParams(
            # "parallel": sample blocks shard across both v7x TensorCores.
            dimension_semantics=("parallel",)),
        cost_estimate=pl.CostEstimate(
            flops=s_pad * (2 * n * n * width + 6 * n * n * width
                           + 2 * n ** 3 + 2 * n * n),
            transcendentals=s_pad * (width * n * n + n * n + n),
            bytes_accessed=4 * (n * n + s_pad * n * (width + 2))),
    )(l1, hfw, ffw)

    latent = out.reshape(s_pad, n)[:s]
    if squeeze_out:
        latent = latent[0]
    scale = jnp.sqrt(jnp.float32(NOISE))
    # TODO(synk): psd_safe_cholesky's data-dependent jitter-retry loop is not
    # ported; the fixed +1e-4*I jitter (plus a pivot floor) keeps these
    # covariances PD here.
    # TODO(synk): the train_x != inputs predictive branch (triangular_solve +
    # cross-covariance interpolation) is not implemented.
    # TODO(synk): for large N, tile the covariances over a blocked grid, swap
    # the unrolled Cholesky for a fori_loop / blocked-panel (MXU Schur update)
    # variant, drop the (N, N) iota masks, and set vmem_limit_bytes for v7x's
    # 64 MiB VMEM.
    return latent, scale


if __name__ == "__main__":
    key = jax.random.PRNGKey(0)
    k_x, k_h, k_f = jax.random.split(key, 3)

    N, D, S = 16, 4, 32   # 16 training points, 4 features, 32 HMC samples
    inputs = jax.random.normal(k_x, (N, D), dtype=jnp.float32)
    # Deterministic stand-ins for the pyro Normal(0, 1) whitened samples.
    hidden_fns_whitened = jax.random.normal(k_h, (S, WIDTH, N), dtype=jnp.float32)
    final_fns_whitened = jax.random.normal(k_f, (S, 1, N), dtype=jnp.float32)

    mean, scale = deep_gp_3l2l_forward(inputs, hidden_fns_whitened,
                                       final_fns_whitened)
    jax.block_until_ready(mean)
    jax.block_until_ready(scale)

    # Pure-JAX reference mirroring the torch math (rbf_kernel, add_2l_kernel,
    # torch.cholesky) for every HMC sample.
    def _ref_forward(x, hfw, ffw):
        nn = x.shape[-2]
        hi = jax.lax.Precision.HIGHEST
        xs = x / LS1
        diff = xs[:, None, :] - xs[None, :, :]
        hcov = jnp.exp(-0.5 * jnp.sum(diff * diff, -1)) * OS1 + JITTER * jnp.eye(nn)
        l1 = jnp.linalg.cholesky(hcov)
        u = jnp.einsum('ij,swj->swi', l1, hfw, precision=hi) / LS2   # (S, W, nn)
        dm = (u[:, :, :, None] - u[:, :, None, :]) ** 2              # (S, W, nn, nn)
        kern = jnp.mean(jnp.exp(-0.5 * dm) * OS2, axis=1)            # (S, nn, nn)
        fcov = OS3 * LS3 / jnp.sqrt((OS2 - kern) * 2.0 + LS3 ** 2) + JITTER * jnp.eye(nn)
        l2 = jnp.linalg.cholesky(fcov)
        return jnp.einsum('sij,sj->si', l2, ffw[:, 0, :], precision=hi)

    ref = _ref_forward(inputs, hidden_fns_whitened, final_fns_whitened)

    assert mean.shape == (S, N)
    assert mean.dtype == jnp.float32
    assert abs(float(scale) - math.sqrt(NOISE)) < 1e-6
    assert bool(jnp.all(jnp.isfinite(mean)))
    assert bool(jnp.allclose(mean, ref, atol=5e-3, rtol=5e-3))

    # Also exercise the unbatched (single HMC sample) path of the wrapper.
    m1, _ = deep_gp_3l2l_forward(inputs, hidden_fns_whitened[0],
                                 final_fns_whitened[0])
    jax.block_until_ready(m1)
    assert m1.shape == (N,)
    assert bool(jnp.allclose(m1, ref[0], atol=5e-3, rtol=5e-3))

    print("KERNEL_OK")
</pallas_src>

<mosaic_0001>
module attributes {stable_mosaic.version = 11 : i64} {
  func.func @_layer1_chol_kernel(%arg0: i32, %arg1: memref<16x4xf32, #tpu.memory_space<vmem>>, %arg2: memref<4x16xf32, #tpu.memory_space<vmem>>, %arg3: memref<16x16xf32, #tpu.memory_space<vmem>>, %arg4: memref<1x16x16xf32, #tpu.memory_space<vmem>>) attributes {dimension_semantics = [#tpu.dimension_semantics<arbitrary>], iteration_bounds = array<i64: 1>, scalar_prefetch = 0 : i64, scratch_operands = 1 : i64, tpu.core_type = #tpu.core_type<tc>, window_params = [{pipeline_mode = #tpu.pipeline_mode<synchronous>, transform_indices = @transform_0, window_bounds = array<i64: 16, 4>}, {pipeline_mode = #tpu.pipeline_mode<synchronous>, transform_indices = @transform_1, window_bounds = array<i64: 4, 16>}, {pipeline_mode = #tpu.pipeline_mode<synchronous>, transform_indices = @transform_2, window_bounds = array<i64: 16, 16>}]} {
    %c0 = arith.constant 0 : index
    %c0_0 = arith.constant 0 : index
    %0 = vector.load %arg1[%c0, %c0_0] : memref<16x4xf32, #tpu.memory_space<vmem>>, vector<16x4xf32>
    %cst = arith.constant 1.000000e+00 : f32
    %1 = vector.broadcast %cst : f32 to vector<16x4xf32>
    %2 = arith.mulf %0, %1 : vector<16x4xf32>
    %c0_1 = arith.constant 0 : index
    %c0_2 = arith.constant 0 : index
    %3 = vector.load %arg2[%c0_1, %c0_2] : memref<4x16xf32, #tpu.memory_space<vmem>>, vector<4x16xf32>
    %cst_3 = arith.constant 1.000000e+00 : f32
    %4 = vector.broadcast %cst_3 : f32 to vector<4x16xf32>
    %5 = arith.mulf %3, %4 : vector<4x16xf32>
    %6 = arith.mulf %2, %2 : vector<16x4xf32>
    %cst_4 = arith.constant dense<0.000000e+00> : vector<16xf32>
    %7 = vector.multi_reduction <add>, %6, %cst_4 [1] : vector<16x4xf32> to vector<16xf32>
    %8 = vector.shape_cast %7 : vector<16xf32> to vector<16x1xf32>
    %9 = arith.mulf %5, %5 : vector<4x16xf32>
    %cst_5 = arith.constant dense<0.000000e+00> : vector<16xf32>
    %10 = vector.multi_reduction <add>, %9, %cst_5 [0] : vector<4x16xf32> to vector<16xf32>
    %11 = vector.shape_cast %10 : vector<16xf32> to vector<1x16xf32>
    %cst_6 = arith.constant dense<0.000000e+00> : vector<16x16xf32>
    %12 = tpu.matmul %2, %2, %cst_6 {dimension_numbers = #tpu.dot_dimension_numbers<[1], [1], [0], [0], [0, 0, 1, 0], [], []>} : vector<16x4xf32>, vector<16x4xf32>, vector<16x16xf32> -> vector<16x16xf32>
    %13 = vector.broadcast %8 : vector<16x1xf32> to vector<16x16xf32>
    %14 = vector.broadcast %11 : vector<1x16xf32> to vector<16x16xf32>
    %15 = arith.addf %13, %14 : vector<16x16xf32>
    %cst_7 = arith.constant 2.000000e+00 : f32
    %16 = vector.broadcast %cst_7 : f32 to vector<16x16xf32>
    %17 = arith.mulf %16, %12 : vector<16x16xf32>
    %18 = arith.subf %15, %17 : vector<16x16xf32>
    %cst_8 = arith.constant 0.000000e+00 : f32
    %19 = vector.broadcast %cst_8 : f32 to vector<16x16xf32>
    %20 = arith.maximumf %18, %19 : vector<16x16xf32>
    %21 = tpu.iota {dimensions = array<i32: 0>} : vector<16x16xi32>
    %22 = tpu.iota {dimensions = array<i32: 1>} : vector<16x16xi32>
    %cst_9 = arith.constant -5.000000e-01 : f32
    %23 = vector.broadcast %cst_9 : f32 to vector<16x16xf32>
    %24 = arith.mulf %20, %23 : vector<16x16xf32>
    %25 = math.exp %24 : vector<16x16xf32>
    %cst_10 = arith.constant 1.000000e+00 : f32
    %26 = vector.broadcast %cst_10 : f32 to vector<16x16xf32>
    %27 = arith.mulf %25, %26 : vector<16x16xf32>
    %28 = arith.cmpi eq, %21, %22 : vector<16x16xi32>
    %cst_11 = arith.constant 9.99999974E-5 : f32
    %cst_12 = arith.constant 0.000000e+00 : f32
    %29 = vector.broadcast %cst_11 : f32 to vector<16x16xf32>
    %30 = vector.broadcast %cst_12 : f32 to vector<16x16xf32>
    %31 = arith.select %28, %29, %30 : vector<16x16xi1>, vector<16x16xf32>
    %32 = arith.addf %27, %31 : vector<16x16xf32>
    %33 = vector.shape_cast %32 : vector<16x16xf32> to vector<1x16x16xf32>
    %c0_13 = arith.constant 0 : index
    %c0_14 = arith.constant 0 : index
    %c0_15 = arith.constant 0 : index
    %34 = vector.load %arg4[%c0_13, %c0_14, %c0_15] : memref<1x16x16xf32, #tpu.memory_space<vmem>>, vector<1x16x16xf32>
    tpu.vector_store %arg4[%c0_13, %c0_14, %c0_15], %33 {strides = array<i32>} : memref<1x16x16xf32, #tpu.memory_space<vmem>>, vector<1x16x16xf32>,
    %35 = tpu.iota {dimensions = array<i32: 0>} : vector<16x1xi32>
    %36 = tpu.iota {dimensions = array<i32: 1>} : vector<1x16xi32>
    %37 = tpu.iota {dimensions = array<i32: 1>} : vector<16x16xi32>
    %c0_16 = arith.constant 0 : index
    %c0_17 = arith.constant 0 : index
    %c0_18 = arith.constant 0 : index
    %38 = vector.load %arg4[%c0_16, %c0_17, %c0_18] : memref<1x16x16xf32, #tpu.memory_space<vmem>>, vector<1x1x16xf32>
    %c0_19 = arith.constant 0 : index
    %c0_20 = arith.constant 0 : index
    %c0_21 = arith.constant 0 : index
    %39 = vector.load %arg4[%c0_19, %c0_20, %c0_21] : memref<1x16x16xf32, #tpu.memory_space<vmem>>, vector<1x16x1xf32>
    %c0_22 = arith.constant 0 : index
    %c0_23 = arith.constant 0 : index
    %c0_24 = arith.constant 0 : index
    %40 = vector.load %arg4[%c0_22, %c0_23, %c0_24] : memref<1x16x16xf32, #tpu.memory_space<vmem>>, vector<1x1x1xf32>
    %cst_25 = arith.constant 9.99999968E-21 : f32
    %41 = vector.broadcast %cst_25 : f32 to vector<1x1x1xf32>
    %42 = arith.maximumf %40, %41 : vector<1x1x1xf32>
    %43 = math.rsqrt %42 : vector<1x1x1xf32>
    %44 = vector.broadcast %43 : vector<1x1x1xf32> to vector<1x16x1xf32>
    %45 = arith.mulf %39, %44 : vector<1x16x1xf32>
    %c0_i32 = arith.constant 0 : i32
    %46 = vector.broadcast %c0_i32 : i32 to vector<16x1xi32>
    %47 = arith.cmpi sgt, %35, %46 : vector<16x1xi32>
    %cst_26 = arith.constant 0.000000e+00 : f32
    %48 = vector.shape_cast %47 : vector<16x1xi1> to vector<1x16x1xi1>
    %49 = vector.broadcast %cst_26 : f32 to vector<1x16x1xf32>
    %50 = arith.select %48, %45, %49 : vector<1x16x1xi1>, vector<1x16x1xf32>
    %c0_i32_27 = arith.constant 0 : i32
    %51 = vector.broadcast %c0_i32_27 : i32 to vector<1x16xi32>
    %52 = arith.cmpi sgt, %36, %51 : vector<1x16xi32>
    %53 = vector.broadcast %43 : vector<1x1x1xf32> to vector<1x1x16xf32>
    %54 = arith.mulf %38, %53 : vector<1x1x16xf32>
    %cst_28 = arith.constant 0.000000e+00 : f32
    %55 = vector.shape_cast %52 : vector<1x16xi1> to vector<1x1x16xi1>
    %56 = vector.broadcast %cst_28 : f32 to vector<1x1x16xf32>
    %57 = arith.select %55, %54, %56 : vector<1x1x16xi1>, vector<1x1x16xf32>
    %c0_i32_29 = arith.constant 0 : i32
    %58 = vector.broadcast %c0_i32_29 : i32 to vector<16x1xi32>
    %59 = arith.cmpi sge, %35, %58 : vector<16x1xi32>
    %cst_30 = arith.constant 0.000000e+00 : f32
    %60 = vector.shape_cast %59 : vector<16x1xi1> to vector<1x16x1xi1>
    %61 = vector.broadcast %cst_30 : f32 to vector<1x16x1xf32>
    %62 = arith.select %60, %45, %61 : vector<1x16x1xi1>, vector<1x16x1xf32>
    %c0_i32_31 = arith.constant 0 : i32
    %63 = vector.broadcast %c0_i32_31 : i32 to vector<16x16xi32>
    %64 = arith.cmpi eq, %37, %63 : vector<16x16xi32>
    %c0_32 = arith.constant 0 : index
    %c0_33 = arith.constant 0 : index
    %c0_34 = arith.constant 0 : index
    %65 = vector.load %arg4[%c0_32, %c0_33, %c0_34] : memref<1x16x16xf32, #tpu.memory_space<vmem>>, vector<1x16x16xf32>
    %66 = vector.broadcast %50 : vector<1x16x1xf32> to vector<1x16x16xf32>
    %67 = vector.broadcast %57 : vector<1x1x16xf32> to vector<1x16x16xf32>
    %68 = arith.mulf %66, %67 : vector<1x16x16xf32>
    %69 = arith.subf %65, %68 : vector<1x16x16xf32>
    %70 = vector.shape_cast %64 : vector<16x16xi1> to vector<1x16x16xi1>
    %71 = vector.shape_cast %62 : vector<1x16x1xf32> to vector<1x16x1xf32>
    %72 = vector.broadcast %71 : vector<1x16x1xf32> to vector<1x16x16xf32>
    %73 = arith.select %70, %72, %69 : vector<1x16x16xi1>, vector<1x16x16xf32>
    %c0_35 = arith.constant 0 : index
    %c0_36 = arith.constant 0 : index
    %c0_37 = arith.constant 0 : index
    %74 = vector.load %arg4[%c0_35, %c0_36, %c0_37] : memref<1x16x16xf32, #tpu.memory_space<vmem>>, vector<1x16x16xf32>
    tpu.vector_store %arg4[%c0_35, %c0_36, %c0_37], %73 {strides = array<i32>} : memref<1x16x16xf32, #tpu.memory_space<vmem>>, vector<1x16x16xf32>,
    %c0_38 = arith.constant 0 : index
    %c1 = arith.constant 1 : index
    %c0_39 = arith.constant 0 : index
    %75 = vector.load %arg4[%c0_38, %c1, %c0_39] : memref<1x16x16xf32, #tpu.memory_space<vmem>>, vector<1x1x16xf32>
    %c0_40 = arith.constant 0 : index
    %c0_41 = arith.constant 0 : index
    %c1_42 = arith.constant 1 : index
    %76 = vector.load %arg4[%c0_40, %c0_41, %c1_42] : memref<1x16x16xf32, #tpu.memory_space<vmem>>, vector<1x16x1xf32>
    %c0_43 = arith.constant 0 : index
    %c1_44 = arith.constant 1 : index
    %c1_45 = arith.constant 1 : index
    %77 = vector.load %arg4[%c0_43, %c1_44, %c1_45] : memref<1x16x16xf32, #tpu.memory_space<vmem>>, vector<1x1x1xf32>
    %cst_46 = arith.constant 9.99999968E-21 : f32
    %78 = vector.broadcast %cst_46 : f32 to vector<1x1x1xf32>
    %79 = arith.maximumf %77, %78 : vector<1x1x1xf32>
    %80 = math.rsqrt %79 : vector<1x1x1xf32>
    %81 = vector.broadcast %80 : vector<1x1x1xf32> to vector<1x16x1xf32>
    %82 = arith.mulf %76, %81 : vector<1x16x1xf32>
    %c1_i32 = arith.constant 1 : i32
    %83 = vector.broadcast %c1_i32 : i32 to vector<16x1xi32>
    %84 = arith.cmpi sgt, %35, %83 : vector<16x1xi32>
    %cst_47 = arith.constant 0.000000e+00 : f32
    %85 = vector.shape_cast %84 : vector<16x1xi1> to vector<1x16x1xi1>
    %86 = vector.broadcast %cst_47 : f32 to vector<1x16x1xf32>
    %87 = arith.select %85, %82, %86 : vector<1x16x1xi1>, vector<1x16x1xf32>
    %c1_i32_48 = arith.constant 1 : i32
    %88 = vector.broadcast %c1_i32_48 : i32 to vector<1x16xi32>
    %89 = arith.cmpi sgt, %36, %88 : vector<1x16xi32>
    %90 = vector.broadcast %80 : vector<1x1x1xf32> to vector<1x1x16xf32>
    %91 = arith.mulf %75, %90 : vector<1x1x16xf32>
    %cst_49 = arith.constant 0.000000e+00 : f32
    %92 = vector.shape_cast %89 : vector<1x16xi1> to vector<1x1x16xi1>
    %93 = vector.broadcast %cst_49 : f32 to vector<1x1x16xf32>
    %94 = arith.select %92, %91, %93 : vector<1x1x16xi1>, vector<1x1x16xf32>
    %c1_i32_50 = arith.constant 1 : i32
    %95 = vector.broadcast %c1_i32_50 : i32 to vector<16x1xi32>
    %96 = arith.cmpi sge, %35, %95 : vector<16x1xi32>
    %cst_51 = arith.constant 0.000000e+00 : f32
    %97 = vector.shape_cast %96 : vector<16x1xi1> to vector<1x16x1xi1>
    %98 = vector.broadcast %cst_51 : f32 to vector<1x16x1xf32>
    %99 = arith.select %97, %82, %98 : vector<1x16x1xi1>, vector<1x16x1xf32>
    %c1_i32_52 = arith.constant 1 : i32
    %100 = vector.broadcast %c1_i32_52 : i32 to vector<16x16xi32>
    %101 = arith.cmpi eq, %37, %100 : vector<16x16xi32>
    %c0_53 = arith.constant 0 : index
    %c0_54 = arith.constant 0 : index
    %c0_55 = arith.constant 0 : index
    %102 = vector.load %arg4[%c0_53, %c0_54, %c0_55] : memref<1x16x16xf32, #tpu.memory_space<vmem>>, vector<1x16x16xf32>
    %103 = vector.broadcast %87 : vector<1x16x1xf32> to vector<1x16x16xf32>
    %104 = vector.broadcast %94 : vector<1x1x16xf32> to vector<1x16x16xf32>
    %105 = arith.mulf %103, %104 : vector<1x16x16xf32>
    %106 = arith.subf %102, %105 : vector<1x16x16xf32>
    %107 = vector.shape_cast %101 : vector<16x16xi1> to vector<1x16x16xi1>
    %108 = vector.shape_cast %99 : vector<1x16x1xf32> to vector<1x16x1xf32>
    %109 = vector.broadcast %108 : vector<1x16x1xf32> to vector<1x16x16xf32>
    %110 = arith.select %107, %109, %106 : vector<1x16x16xi1>, vector<1x16x16xf32>
    %c0_56 = arith.constant 0 : index
    %c0_57 = arith.constant 0 : index
    %c0_58 = arith.constant 0 : index
    %111 = vector.load %arg4[%c0_56, %c0_57, %c0_58] : memref<1x16x16xf32, #tpu.memory_space<vmem>>, vector<1x16x16xf32>
    tpu.vector_store %arg4[%c0_56, %c0_57, %c0_58], %110 {strides = array<i32>} : memref<1x16x16xf32, #tpu.memory_space<vmem>>, vector<1x16x16xf32>,
    %c0_59 = arith.constant 0 : index
    %c2 = arith.constant 2 : index
    %c0_60 = arith.constant 0 : index
    %112 = vector.load %arg4[%c0_59, %c2, %c0_60] : memref<1x16x16xf32, #tpu.memory_space<vmem>>, vector<1x1x16xf32>
    %c0_61 = arith.constant 0 : index
    %c0_62 = arith.constant 0 : index
    %c2_63 = arith.constant 2 : index
    %113 = vector.load %arg4[%c0_61, %c0_62, %c2_63] : memref<1x16x16xf32, #tpu.memory_space<vmem>>, vector<1x16x1xf32>
    %c0_64 = arith.constant 0 : index
    %c2_65 = arith.constant 2 : index
    %c2_66 = arith.constant 2 : index
    %114 = vector.load %arg4[%c0_64, %c2_65, %c2_66] : memref<1x16x16xf32, #tpu.memory_space<vmem>>, vector<1x1x1xf32>
    %cst_67 = arith.constant 9.99999968E-21 : f32
    %115 = vector.broadcast %cst_67 : f32 to vector<1x1x1xf32>
    %116 = arith.maximumf %114, %115 : vector<1x1x1xf32>
    %117 = math.rsqrt %116 : vector<1x1x1xf32>
    %118 = vector.broadcast %117 : vector<1x1x1xf32> to vector<1x16x1xf32>
    %119 = arith.mulf %113, %118 : vector<1x16x1xf32>
    %c2_i32 = arith.constant 2 : i32
    %120 = vector.broadcast %c2_i32 : i32 to vector<16x1xi32>
    %121 = arith.cmpi sgt, %35, %120 : vector<16x1xi32>
    %cst_68 = arith.constant 0.000000e+00 : f32
    %122 = vector.shape_cast %121 : vector<16x1xi1> to vector<1x16x1xi1>
    %123 = vector.broadcast %cst_68 : f32 to vector<1x16x1xf32>
    %124 = arith.select %122, %119, %123 : vector<1x16x1xi1>, vector<1x16x1xf32>
    %c2_i32_69 = arith.constant 2 : i32
    %125 = vector.broadcast %c2_i32_69 : i32 to vector<1x16xi32>
    %126 = arith.cmpi sgt, %36, %125 : vector<1x16xi32>
    %127 = vector.broadcast %117 : vector<1x1x1xf32> to vector<1x1x16xf32>
    %128 = arith.mulf %112, %127 : vector<1x1x16xf32>
    %cst_70 = arith.constant 0.000000e+00 : f32
    %129 = vector.shape_cast %126 : vector<1x16xi1> to vector<1x1x16xi1>
    %130 = vector.broadcast %cst_70 : f32 to vector<1x1x16xf32>
    %131 = arith.select %129, %128, %130 : vector<1x1x16xi1>, vector<1x1x16xf32>
    %c2_i32_71 = arith.constant 2 : i32
    %132 = vector.broadcast %c2_i32_71 : i32 to vector<16x1xi32>
    %133 = arith.cmpi sge, %35, %132 : vector<16x1xi32>
    %cst_72 = arith.constant 0.000000e+00 : f32
    %134 = vector.shape_cast %133 : vector<16x1xi1> to vector<1x16x1xi1>
    %135 = vector.broadcast %cst_72 : f32 to vector<1x16x1xf32>
    %136 = arith.select %134, %119, %135 : vector<1x16x1xi1>, vector<1x16x1xf32>
    %c2_i32_73 = arith.constant 2 : i32
    %137 = vector.broadcast %c2_i32_73 : i32 to vector<16x16xi32>
    %138 = arith.cmpi eq, %37, %137 : vector<16x16xi32>
    %c0_74 = arith.constant 0 : index
    %c0_75 = arith.constant 0 : index
    %c0_76 = arith.constant 0 : index
    %139 = vector.load %arg4[%c0_74, %c0_75, %c0_76] : memref<1x16x16xf32, #tpu.memory_space<vmem>>, vector<1x16x16xf32>
    %140 = vector.broadcast %124 : vector<1x16x1xf32> to vector<1x16x16xf32>
    %141 = vector.broadcast %131 : vector<1x1x16xf32> to vector<1x16x16xf32>
    %142 = arith.mulf %140, %141 : vector<1x16x16xf32>
    %143 = arith.subf %139, %142 : vector<1x16x16xf32>
    %144 = vector.shape_cast %138 : vector<16x16xi1> to vector<1x16x16xi1>
    %145 = vector.shape_cast %136 : vector<1x16x1xf32> to vector<1x16x1xf32>
    %146 = vector.broadcast %145 : vector<1x16x1xf32> to vector<1x16x16xf32>
    %147 = arith.select %144, %146, %143 : vector<1x16x16xi1>, vector<1x16x16xf32>
    %c0_77 = arith.constant 0 : index
    %c0_78 = arith.constant 0 : index
    %c0_79 = arith.constant 0 : index
    %148 = vector.load %arg4[%c0_77, %c0_78, %c0_79] : memref<1x16x16xf32, #tpu.memory_space<vmem>>, vector<1x16x16xf32>
    tpu.vector_store %arg4[%c0_77, %c0_78, %c0_79], %147 {strides = array<i32>} : memref<1x16x16xf32, #tpu.memory_space<vmem>>, vector<1x16x16xf32>,
    %c0_80 = arith.constant 0 : index
    %c3 = arith.constant 3 : index
    %c0_81 = arith.constant 0 : index
    %149 = vector.load %arg4[%c0_80, %c3, %c0_81] : memref<1x16x16xf32, #tpu.memory_space<vmem>>, vector<1x1x16xf32>
    %c0_82 = arith.constant 0 : index
    %c0_83 = arith.constant 0 : index
    %c3_84 = arith.constant 3 : index
    %150 = vector.load %arg4[%c0_82, %c0_83, %c3_84] : memref<1x16x16xf32, #tpu.memory_space<vmem>>, vector<1x16x1xf32>
    %c0_85 = arith.constant 0 : index
    %c3_86 = arith.constant 3 : index
    %c3_87 = arith.constant 3 : index
    %151 = vector.load %arg4[%c0_85, %c3_86, %c3_87] : memref<1x16x16xf32, #tpu.memory_space<vmem>>, vector<1x1x1xf32>
    %cst_88 = arith.constant 9.99999968E-21 : f32
    %152 = vector.broadcast %cst_88 : f32 to vector<1x1x1xf32>
    %153 = arith.maximumf %151, %152 : vector<1x1x1xf32>
    %154 = math.rsqrt %153 : vector<1x1x1xf32>
    %155 = vector.broadcast %154 : vector<1x1x1xf32> to vector<1x16x1xf32>
    %156 = arith.mulf %150, %155 : vector<1x16x1xf32>
    %c3_i32 = arith.constant 3 : i32
    %157 = vector.broadcast %c3_i32 : i32 to vector<16x1xi32>
    %158 = arith.cmpi sgt, %35, %157 : vector<16x1xi32>
    %cst_89 = arith.constant 0.000000e+00 : f32
    %159 = vector.shape_cast %158 : vector<16x1xi1> to vector<1x16x1xi1>
    %160 = vector.broadcast %cst_89 : f32 to vector<1x16x1xf32>
    %161 = arith.select %159, %156, %160 : vector<1x16x1xi1>, vector<1x16x1xf32>
    %c3_i32_90 = arith.constant 3 : i32
    %162 = vector.broadcast %c3_i32_90 : i32 to vector<1x16xi32>
    %163 = arith.cmpi sgt, %36, %162 : vector<1x16xi32>
    %164 = vector.broadcast %154 : vector<1x1x1xf32> to vector<1x1x16xf32>
    %165 = arith.mulf %149, %164 : vector<1x1x16xf32>
    %cst_91 = arith.constant 0.000000e+00 : f32
    %166 = vector.shape_cast %163 : vector<1x16xi1> to vector<1x1x16xi1>
    %167 = vector.broadcast %cst_91 : f32 to vector<1x1x16xf32>
    %168 = arith.select %166, %165, %167 : vector<1x1x16xi1>, vector<1x1x16xf32>
    %c3_i32_92 = arith.constant 3 : i32
    %169 = vector.broadcast %c3_i32_92 : i32 to vector<16x1xi32>
    %170 = arith.cmpi sge, %35, %169 : vector<16x1xi32>
    %cst_93 = arith.constant 0.000000e+00 : f32
    %171 = vector.shape_cast %170 : vector<16x1xi1> to vector<1x16x1xi1>
    %172 = vector.broadcast %cst_93 : f32 to vector<1x16x1xf32>
    %173 = arith.select %171, %156, %172 : vector<1x16x1xi1>, vector<1x16x1xf32>
    %c3_i32_94 = arith.constant 3 : i32
    %174 = vector.broadcast %c3_i32_94 : i32 to vector<16x16xi32>
    %175 = arith.cmpi eq, %37, %174 : vector<16x16xi32>
    %c0_95 = arith.constant 0 : index
    %c0_96 = arith.constant 0 : index
    %c0_97 = arith.constant 0 : index
    %176 = vector.load %arg4[%c0_95, %c0_96, %c0_97] : memref<1x16x16xf32, #tpu.memory_space<vmem>>, vector<1x16x16xf32>
    %177 = vector.broadcast %161 : vector<1x16x1xf32> to vector<1x16x16xf32>
    %178 = vector.broadcast %168 : vector<1x1x16xf32> to vector<1x16x16xf32>
    %179 = arith.mulf %177, %178 : vector<1x16x16xf32>
    %180 = arith.subf %176, %179 : vector<1x16x16xf32>
    %181 = vector.shape_cast %175 : vector<16x16xi1> to vector<1x16x16xi1>
    %182 = vector.shape_cast %173 : vector<1x16x1xf32> to vector<1x16x1xf32>
    %183 = vector.broadcast %182 : vector<1x16x1xf32> to vector<1x16x16xf32>
    %184 = arith.select %181, %183, %180 : vector<1x16x16xi1>, vector<1x16x16xf32>
    %c0_98 = arith.constant 0 : index
    %c0_99 = arith.constant 0 : index
    %c0_100 = arith.constant 0 : index
    %185 = vector.load %arg4[%c0_98, %c0_99, %c0_100] : memref<1x16x16xf32, #tpu.memory_space<vmem>>, vector<1x16x16xf32>
    tpu.vector_store %arg4[%c0_98, %c0_99, %c0_100], %184 {strides = array<i32>} : memref<1x16x16xf32, #tpu.memory_space<vmem>>, vector<1x16x16xf32>,
    %c0_101 = arith.constant 0 : index
    %c4 = arith.constant 4 : index
    %c0_102 = arith.constant 0 : index
    %186 = vector.load %arg4[%c0_101, %c4, %c0_102] : memref<1x16x16xf32, #tpu.memory_space<vmem>>, vector<1x1x16xf32>
    %c0_103 = arith.constant 0 : index
    %c0_104 = arith.constant 0 : index
    %c4_105 = arith.constant 4 : index
    %187 = vector.load %arg4[%c0_103, %c0_104, %c4_105] : memref<1x16x16xf32, #tpu.memory_space<vmem>>, vector<1x16x1xf32>
    %c0_106 = arith.constant 0 : index
    %c4_107 = arith.constant 4 : index
    %c4_108 = arith.constant 4 : index
    %188 = vector.load %arg4[%c0_106, %c4_107, %c4_108] : memref<1x16x16xf32, #tpu.memory_space<vmem>>, vector<1x1x1xf32>
    %cst_109 = arith.constant 9.99999968E-21 : f32
    %189 = vector.broadcast %cst_109 : f32 to vector<1x1x1xf32>
    %190 = arith.maximumf %188, %189 : vector<1x1x1xf32>
    %191 = math.rsqrt %190 : vector<1x1x1xf32>
    %192 = vector.broadcast %191 : vector<1x1x1xf32> to vector<1x16x1xf32>
    %193 = arith.mulf %187, %192 : vector<1x16x1xf32>
    %c4_i32 = arith.constant 4 : i32
    %194 = vector.broadcast %c4_i32 : i32 to vector<16x1xi32>
    %195 = arith.cmpi sgt, %35, %194 : vector<16x1xi32>
    %cst_110 = arith.constant 0.000000e+00 : f32
    %196 = vector.shape_cast %195 : vector<16x1xi1> to vector<1x16x1xi1>
    %197 = vector.broadcast %cst_110 : f32 to vector<1x16x1xf32>
    %198 = arith.select %196, %193, %197 : vector<1x16x1xi1>, vector<1x16x1xf32>
    %c4_i32_111 = arith.constant 4 : i32
    %199 = vector.broadcast %c4_i32_111 : i32 to vector<1x16xi32>
    %200 = arith.cmpi sgt, %36, %199 : vector<1x16xi32>
    %201 = vector.broadcast %191 : vector<1x1x1xf32> to vector<1x1x16xf32>
    %202 = arith.mulf %186, %201 : vector<1x1x16xf32>
    %cst_112 = arith.constant 0.000000e+00 : f32
    %203 = vector.shape_cast %200 : vector<1x16xi1> to vector<1x1x16xi1>
    %204 = vector.broadcast %cst_112 : f32 to vector<1x1x16xf32>
    %205 = arith.select %203, %202, %204 : vector<1x1x16xi1>, vector<1x1x16xf32>
    %c4_i32_113 = arith.constant 4 : i32
    %206 = vector.broadcast %c4_i32_113 : i32 to vector<16x1xi32>
    %207 = arith.cmpi sge, %35, %206 : vector<16x1xi32>
    %cst_114 = arith.constant 0.000000e+00 : f32
    %208 = vector.shape_cast %207 : vector<16x1xi1> to vector<1x16x1xi1>
    %209 = vector.broadcast %cst_114 : f32 to vector<1x16x1xf32>
    %210 = arith.select %208, %193, %209 : vector<1x16x1xi1>, vector<1x16x1xf32>
    %c4_i32_115 = arith.constant 4 : i32
    %211 = vector.broadcast %c4_i32_115 : i32 to vector<16x16xi32>
    %212 = arith.cmpi eq, %37, %211 : vector<16x16xi32>
    %c0_116 = arith.constant 0 : index
    %c0_117 = arith.constant 0 : index
    %c0_118 = arith.constant 0 : index
    %213 = vector.load %arg4[%c0_116, %c0_117, %c0_118] : memref<1x16x16xf32, #tpu.memory_space<vmem>>, vector<1x16x16xf32>
    %214 = vector.broadcast %198 : vector<1x16x1xf32> to vector<1x16x16xf32>
    %215 = vector.broadcast %205 : vector<1x1x16xf32> to vector<1x16x16xf32>
    %216 = arith.mulf %214, %215 : vector<1x16x16xf32>
    %217 = arith.subf %213, %216 : vector<1x16x16xf32>
    %218 = vector.shape_cast %212 : vector<16x16xi1> to vector<1x16x16xi1>
    %219 = vector.shape_cast %210 : vector<1x16x1xf32> to vector<1x16x1xf32>
    %220 = vector.broadcast %219 : vector<1x16x1xf32> to vector<1x16x16xf32>
    %221 = arith.select %218, %220, %217 : vector<1x16x16xi1>, vector<1x16x16xf32>
    %c0_119 = arith.constant 0 : index
    %c0_120 = arith.constant 0 : index
    %c0_121 = arith.constant 0 : index
    %222 = vector.load %arg4[%c0_119, %c0_120, %c0_121] : memref<1x16x16xf32, #tpu.memory_space<vmem>>, vector<1x16x16xf32>
    tpu.vector_store %arg4[%c0_119, %c0_120, %c0_121], %221 {strides = array<i32>} : memref<1x16x16xf32, #tpu.memory_space<vmem>>, vector<1x16x16xf32>,
    %c0_122 = arith.constant 0 : index
    %c5 = arith.constant 5 : index
    %c0_123 = arith.constant 0 : index
    %223 = vector.load %arg4[%c0_122, %c5, %c0_123] : memref<1x16x16xf32, #tpu.memory_space<vmem>>, vector<1x1x16xf32>
    %c0_124 = arith.constant 0 : index
    %c0_125 = arith.constant 0 : index
    %c5_126 = arith.constant 5 : index
    %224 = vector.load %arg4[%c0_124, %c0_125, %c5_126] : memref<1x16x16xf32, #tpu.memory_space<vmem>>, vector<1x16x1xf32>
    %c0_127 = arith.constant 0 : index
    %c5_128 = arith.constant 5 : index
    %c5_129 = arith.constant 5 : index
    %225 = vector.load %arg4[%c0_127, %c5_128, %c5_129] : memref<1x16x16xf32, #tpu.memory_space<vmem>>, vector<1x1x1xf32>
    %cst_130 = arith.constant 9.99999968E-21 : f32
    %226 = vector.broadcast %cst_130 : f32 to vector<1x1x1xf32>
    %227 = arith.maximumf %225, %226 : vector<1x1x1xf32>
    %228 = math.rsqrt %227 : vector<1x1x1xf32>
    %229 = vector.broadcast %228 : vector<1x1x1xf32> to vector<1x16x1xf32>
    %230 = arith.mulf %224, %229 : vector<1x16x1xf32>
    %c5_i32 = arith.constant 5 : i32
    %231 = vector.broadcast %c5_i32 : i32 to vector<16x1xi32>
    %232 = arith.cmpi sgt, %35, %231 : vector<16x1xi32>
    %cst_131 = arith.constant 0.000000e+00 : f32
    %233 = vector.shape_cast %232 : vector<16x1xi1> to vector<1x16x1xi1>
    %234 = vector.broadcast %cst_131 : f32 to vector<1x16x1xf32>
    %235 = arith.select %233, %230, %234 : vector<1x16x1xi1>, vector<1x16x1xf32>
    %c5_i32_132 = arith.constant 5 : i32
    %236 = vector.broadcast %c5_i32_132 : i32 to vector<1x16xi32>
    %237 = arith.cmpi sgt, %36, %236 : vector<1x16xi32>
    %238 = vector.broadcast %228 : vector<1x1x1xf32> to vector<1x1x16xf32>
    %239 = arith.mulf %223, %238 : vector<1x1x16xf32>
    %cst_133 = arith.constant 0.000000e+00 : f32
    %240 = vector.shape_cast %237 : vector<1x16xi1> to vector<1x1x16xi1>
    %241 = vector.broadcast %cst_133 : f32 to vector<1x1x16xf32>
    %242 = arith.select %240, %239, %241 : vector<1x1x16xi1>, vector<1x1x16xf32>
    %c5_i32_134 = arith.constant 5 : i32
    %243 = vector.broadcast %c5_i32_134 : i32 to vector<16x1xi32>
    %244 = arith.cmpi sge, %35, %243 : vector<16x1xi32>
    %cst_135 = arith.constant 0.000000e+00 : f32
    %245 = vector.shape_cast %244 : vector<16x1xi1> to vector<1x16x1xi1>
    %246 = vector.broadcast %cst_135 : f32 to vector<1x16x1xf32>
    %247 = arith.select %245, %230, %246 : vector<1x16x1xi1>, vector<1x16x1xf32>
    %c5_i32_136 = arith.constant 5 : i32
    %248 = vector.broadcast %c5_i32_136 : i32 to vector<16x16xi32>
    %249 = arith.cmpi eq, %37, %248 : vector<16x16xi32>
    %c0_137 = arith.constant 0 : index
    %c0_138 = arith.constant 0 : index
    %c0_139 = arith.constant 0 : index
    %250 = vector.load %arg4[%c0_137, %c0_138, %c0_139] : memref<1x16x16xf32, #tpu.memory_space<vmem>>, vector<1x16x16xf32>
    %251 = vector.broadcast %235 : vector<1x16x1xf32> to vector<1x16x16xf32>
    %252 = vector.broadcast %242 : vector<1x1x16xf32> to vector<1x16x16xf32>
    %253 = arith.mulf %251, %252 : vector<1x16x16xf32>
    %254 = arith.subf %250, %253 : vector<1x16x16xf32>
    %255 = vector.shape_cast %249 : vector<16x16xi1> to vector<1x16x16xi1>
    %256 = vector.shape_cast %247 : vector<1x16x1xf32> to vector<1x16x1xf32>
    %257 = vector.broadcast %256 : vector<1x16x1xf32> to vector<1x16x16xf32>
    %258 = arith.select %255, %257, %254 : vector<1x16x16xi1>, vector<1x16x16xf32>
    %c0_140 = arith.constant 0 : index
    %c0_141 = arith.constant 0 : index
    %c0_142 = arith.constant 0 : index
    %259 = vector.load %arg4[%c0_140, %c0_141, %c0_142] : memref<1x16x16xf32, #tpu.memory_space<vmem>>, vector<1x16x16xf32>
    tpu.vector_store %arg4[%c0_140, %c0_141, %c0_142], %258 {strides = array<i32>} : memref<1x16x16xf32, #tpu.memory_space<vmem>>, vector<1x16x16xf32>,
    %c0_143 = arith.constant 0 : index
    %c6 = arith.constant 6 : index
    %c0_144 = arith.constant 0 : index
    %260 = vector.load %arg4[%c0_143, %c6, %c0_144] : memref<1x16x16xf32, #tpu.memory_space<vmem>>, vector<1x1x16xf32>
    %c0_145 = arith.constant 0 : index
    %c0_146 = arith.constant 0 : index
    %c6_147 = arith.constant 6 : index
    %261 = vector.load %arg4[%c0_145, %c0_146, %c6_147] : memref<1x16x16xf32, #tpu.memory_space<vmem>>, vector<1x16x1xf32>
    %c0_148 = arith.constant 0 : index
    %c6_149 = arith.constant 6 : index
    %c6_150 = arith.constant 6 : index
    %262 = vector.load %arg4[%c0_148, %c6_149, %c6_150] : memref<1x16x16xf32, #tpu.memory_space<vmem>>, vector<1x1x1xf32>
    %cst_151 = arith.constant 9.99999968E-21 : f32
    %263 = vector.broadcast %cst_151 : f32 to vector<1x1x1xf32>
    %264 = arith.maximumf %262, %263 : vector<1x1x1xf32>
    %265 = math.rsqrt %264 : vector<1x1x1xf32>
    %266 = vector.broadcast %265 : vector<1x1x1xf32> to vector<1x16x1xf32>
    %267 = arith.mulf %261, %266 : vector<1x16x1xf32>
    %c6_i32 = arith.constant 6 : i32
    %268 = vector.broadcast %c6_i32 : i32 to vector<16x1xi32>
    %269 = arith.cmpi sgt, %35, %268 : vector<16x1xi32>
    %cst_152 = arith.constant 0.000000e+00 : f32
    %270 = vector.shape_cast %269 : vector<16x1xi1> to vector<1x16x1xi1>
    %271 = vector.broadcast %cst_152 : f32 to vector<1x16x1xf32>
    %272 = arith.select %270, %267, %271 : vector<1x16x1xi1>, vector<1x16x1xf32>
    %c6_i32_153 = arith.constant 6 : i32
    %273 = vector.broadcast %c6_i32_153 : i32 to vector<1x16xi32>
    %274 = arith.cmpi sgt, %36, %273 : vector<1x16xi32>
    %275 = vector.broadcast %265 : vector<1x1x1xf32> to vector<1x1x16xf32>
    %276 = arith.mulf %260, %275 : vector<1x1x16xf32>
    %cst_154 = arith.constant 0.000000e+00 : f32
    %277 = vector.shape_cast %274 : vector<1x16xi1> to vector<1x1x16xi1>
    %278 = vector.broadcast %cst_154 : f32 to vector<1x1x16xf32>
    %279 = arith.select %277, %276, %278 : vector<1x1x16xi1>, vector<1x1x16xf32>
    %c6_i32_155 = arith.constant 6 : i32
    %280 = vector.broadcast %c6_i32_155 : i32 to vector<16x1xi32>
    %281 = arith.cmpi sge, %35, %280 : vector<16x1xi32>
    %cst_156 = arith.constant 0.000000e+00 : f32
    %282 = vector.shape_cast %281 : vector<16x1xi1> to vector<1x16x1xi1>
    %283 = vector.broadcast %cst_156 : f32 to vector<1x16x1xf32>
    %284 = arith.select %282, %267, %283 : vector<1x16x1xi1>, vector<1x16x1xf32>
    %c6_i32_157 = arith.constant 6 : i32
    %285 = vector.broadcast %c6_i32_157 : i32 to vector<16x16xi32>
    %286 = arith.cmpi eq, %37, %285 : vector<16x16xi32>
    %c0_158 = arith.constant 0 : index
    %c0_159 = arith.constant 0 : index
    %c0_160 = arith.constant 0 : index
    %287 = vector.load %arg4[%c0_158, %c0_159, %c0_160] : memref<1x16x16xf32, #tpu.memory_space<vmem>>, vector<1x16x16xf32>
    %288 = vector.broadcast %272 : vector<1x16x1xf32> to vector<1x16x16xf32>
    %289 = vector.broadcast %279 : vector<1x1x16xf32> to vector<1x16x16xf32>
    %290 = arith.mulf %288, %289 : vector<1x16x16xf32>
    %291 = arith.subf %287, %290 : vector<1x16x16xf32>
    %292 = vector.shape_cast %286 : vector<16x16xi1> to vector<1x16x16xi1>
    %293 = vector.shape_cast %284 : vector<1x16x1xf32> to vector<1x16x1xf32>
    %294 = vector.broadcast %293 : vector<1x16x1xf32> to vector<1x16x16xf32>
    %295 = arith.select %292, %294, %291 : vector<1x16x16xi1>, vector<1x16x16xf32>
    %c0_161 = arith.constant 0 : index
    %c0_162 = arith.constant 0 : index
    %c0_163 = arith.constant 0 : index
    %296 = vector.load %arg4[%c0_161, %c0_162, %c0_163] : memref<1x16x16xf32, #tpu.memory_space<vmem>>, vector<1x16x16xf32>
    tpu.vector_store %arg4[%c0_161, %c0_162, %c0_163], %295 {strides = array<i32>} : memref<1x16x16xf32, #tpu.memory_space<vmem>>, vector<1x16x16xf32>,
    %c0_164 = arith.constant 0 : index
    %c7 = arith.constant 7 : index
    %c0_165 = arith.constant 0 : index
    %297 = vector.load %arg4[%c0_164, %c7, %c0_165] : memref<1x16x16xf32, #tpu.memory_space<vmem>>, vector<1x1x16xf32>
    %c0_166 = arith.constant 0 : index
    %c0_167 = arith.constant 0 : index
    %c7_168 = arith.constant 7 : index
    %298 = vector.load %arg4[%c0_166, %c0_167, %c7_168] : memref<1x16x16xf32, #tpu.memory_space<vmem>>, vector<1x16x1xf32>
    %c0_169 = arith.constant 0 : index
    %c7_170 = arith.constant 7 : index
    %c7_171 = arith.constant 7 : index
    %299 = vector.load %arg4[%c0_169, %c7_170, %c7_171] : memref<1x16x16xf32, #tpu.memory_space<vmem>>, vector<1x1x1xf32>
    %cst_172 = arith.constant 9.99999968E-21 : f32
    %300 = vector.broadcast %cst_172 : f32 to vector<1x1x1xf32>
    %301 = arith.maximumf %299, %300 : vector<1x1x1xf32>
    %302 = math.rsqrt %301 : vector<1x1x1xf32>
    %303 = vector.broadcast %302 : vector<1x1x1xf32> to vector<1x16x1xf32>
    %304 = arith.mulf %298, %303 : vector<1x16x1xf32>
    %c7_i32 = arith.constant 7 : i32
    %305 = vector.broadcast %c7_i32 : i32 to vector<16x1xi32>
    %306 = arith.cmpi sgt, %35, %305 : vector<16x1xi32>
    %cst_173 = arith.constant 0.000000e+00 : f32
    %307 = vector.shape_cast %306 : vector<16x1xi1> to vector<1x16x1xi1>
    %308 = vector.broadcast %cst_173 : f32 to vector<1x16x1xf32>
    %309 = arith.select %307, %304, %308 : vector<1x16x1xi1>, vector<1x16x1xf32>
    %c7_i32_174 = arith.constant 7 : i32
    %310 = vector.broadcast %c7_i32_174 : i32 to vector<1x16xi32>
    %311 = arith.cmpi sgt, %36, %310 : vector<1x16xi32>
    %312 = vector.broadcast %302 : vector<1x1x1xf32> to vector<1x1x16xf32>
    %313 = arith.mulf %297, %312 : vector<1x1x16xf32>
    %cst_175 = arith.constant 0.000000e+00 : f32
    %314 = vector.shape_cast %311 : vector<1x16xi1> to vector<1x1x16xi1>
    %315 = vector.broadcast %cst_175 : f32 to vector<1x1x16xf32>
    %316 = arith.select %314, %313, %315 : vector<1x1x16xi1>, vector<1x1x16xf32>
    %c7_i32_176 = arith.constant 7 : i32
    %317 = vector.broadcast %c7_i32_176 : i32 to vector<16x1xi32>
    %318 = arith.cmpi sge, %35, %317 : vector<16x1xi32>
    %cst_177 = arith.constant 0.000000e+00 : f32
    %319 = vector.shape_cast %318 : vector<16x1xi1> to vector<1x16x1xi1>
    %320 = vector.broadcast %cst_177 : f32 to vector<1x16x1xf32>
    %321 = arith.select %319, %304, %320 : vector<1x16x1xi1>, vector<1x16x1xf32>
    %c7_i32_178 = arith.constant 7 : i32
    %322 = vector.broadcast %c7_i32_178 : i32 to vector<16x16xi32>
    %323 = arith.cmpi eq, %37, %322 : vector<16x16xi32>
    %c0_179 = arith.constant 0 : index
    %c0_180 = arith.constant 0 : index
    %c0_181 = arith.constant 0 : index
    %324 = vector.load %arg4[%c0_179, %c0_180, %c0_181] : memref<1x16x16xf32, #tpu.memory_space<vmem>>, vector<1x16x16xf32>
    %325 = vector.broadcast %309 : vector<1x16x1xf32> to vector<1x16x16xf32>
    %326 = vector.broadcast %316 : vector<1x1x16xf32> to vector<1x16x16xf32>
    %327 = arith.mulf %325, %326 : vector<1x16x16xf32>
    %328 = arith.subf %324, %327 : vector<1x16x16xf32>
    %329 = vector.shape_cast %323 : vector<16x16xi1> to vector<1x16x16xi1>
    %330 = vector.shape_cast %321 : vector<1x16x1xf32> to vector<1x16x1xf32>
    %331 = vector.broadcast %330 : vector<1x16x1xf32> to vector<1x16x16xf32>
    %332 = arith.select %329, %331, %328 : vector<1x16x16xi1>, vector<1x16x16xf32>
    %c0_182 = arith.constant 0 : index
    %c0_183 = arith.constant 0 : index
    %c0_184 = arith.constant 0 : index
    %333 = vector.load %arg4[%c0_182, %c0_183, %c0_184] : memref<1x16x16xf32, #tpu.memory_space<vmem>>, vector<1x16x16xf32>
    tpu.vector_store %arg4[%c0_182, %c0_183, %c0_184], %332 {strides = array<i32>} : memref<1x16x16xf32, #tpu.memory_space<vmem>>, vector<1x16x16xf32>,
    %c0_185 = arith.constant 0 : index
    %c8 = arith.constant 8 : index
    %c0_186 = arith.constant 0 : index
    %334 = vector.load %arg4[%c0_185, %c8, %c0_186] : memref<1x16x16xf32, #tpu.memory_space<vmem>>, vector<1x1x16xf32>
    %c0_187 = arith.constant 0 : index
    %c0_188 = arith.constant 0 : index
    %c8_189 = arith.constant 8 : index
    %335 = vector.load %arg4[%c0_187, %c0_188, %c8_189] : memref<1x16x16xf32, #tpu.memory_space<vmem>>, vector<1x16x1xf32>
    %c0_190 = arith.constant 0 : index
    %c8_191 = arith.constant 8 : index
    %c8_192 = arith.constant 8 : index
    %336 = vector.load %arg4[%c0_190, %c8_191, %c8_192] : memref<1x16x16xf32, #tpu.memory_space<vmem>>, vector<1x1x1xf32>
    %cst_193 = arith.constant 9.99999968E-21 : f32
    %337 = vector.broadcast %cst_193 : f32 to vector<1x1x1xf32>
    %338 = arith.maximumf %336, %337 : vector<1x1x1xf32>
    %339 = math.rsqrt %338 : vector<1x1x1xf32>
    %340 = vector.broadcast %339 : vector<1x1x1xf32> to vector<1x16x1xf32>
    %341 = arith.mulf %335, %340 : vector<1x16x1xf32>
    %c8_i32 = arith.constant 8 : i32
    %342 = vector.broadcast %c8_i32 : i32 to vector<16x1xi32>
    %343 = arith.cmpi sgt, %35, %342 : vector<16x1xi32>
    %cst_194 = arith.constant 0.000000e+00 : f32
    %344 = vector.shape_cast %343 : vector<16x1xi1> to vector<1x16x1xi1>
    %345 = vector.broadcast %cst_194 : f32 to vector<1x16x1xf32>
    %346 = arith.select %344, %341, %345 : vector<1x16x1xi1>, vector<1x16x1xf32>
    %c8_i32_195 = arith.constant 8 : i32
    %347 = vector.broadcast %c8_i32_195 : i32 to vector<1x16xi32>
    %348 = arith.cmpi sgt, %36, %347 : vector<1x16xi32>
    %349 = vector.broadcast %339 : vector<1x1x1xf32> to vector<1x1x16xf32>
    %350 = arith.mulf %334, %349 : vector<1x1x16xf32>
    %cst_196 = arith.constant 0.000000e+00 : f32
    %351 = vector.shape_cast %348 : vector<1x16xi1> to vector<1x1x16xi1>
    %352 = vector.broadcast %cst_196 : f32 to vector<1x1x16xf32>
    %353 = arith.select %351, %350, %352 : vector<1x1x16xi1>, vector<1x1x16xf32>
    %c8_i32_197 = arith.constant 8 : i32
    %354 = vector.broadcast %c8_i32_197 : i32 to vector<16x1xi32>
    %355 = arith.cmpi sge, %35, %354 : vector<16x1xi32>
    %cst_198 = arith.constant 0.000000e+00 : f32
    %356 = vector.shape_cast %355 : vector<16x1xi1> to vector<1x16x1xi1>
    %357 = vector.broadcast %cst_198 : f32 to vector<1x16x1xf32>
    %358 = arith.select %356, %341, %357 : vector<1x16x1xi1>, vector<1x16x1xf32>
    %c8_i32_199 = arith.constant 8 : i32
    %359 = vector.broadcast %c8_i32_199 : i32 to vector<16x16xi32>
    %360 = arith.cmpi eq, %37, %359 : vector<16x16xi32>
    %c0_200 = arith.constant 0 : index
    %c0_201 = arith.constant 0 : index
    %c0_202 = arith.constant 0 : index
    %361 = vector.load %arg4[%c0_200, %c0_201, %c0_202] : memref<1x16x16xf32, #tpu.memory_space<vmem>>, vector<1x16x16xf32>
    %362 = vector.broadcast %346 : vector<1x16x1xf32> to vector<1x16x16xf32>
    %363 = vector.broadcast %353 : vector<1x1x16xf32> to vector<1x16x16xf32>
    %364 = arith.mulf %362, %363 : vector<1x16x16xf32>
    %365 = arith.subf %361, %364 : vector<1x16x16xf32>
    %366 = vector.shape_cast %360 : vector<16x16xi1> to vector<1x16x16xi1>
    %367 = vector.shape_cast %358 : vector<1x16x1xf32> to vector<1x16x1xf32>
    %368 = vector.broadcast %367 : vector<1x16x1xf32> to vector<1x16x16xf32>
    %369 = arith.select %366, %368, %365 : vector<1x16x16xi1>, vector<1x16x16xf32>
    %c0_203 = arith.constant 0 : index
    %c0_204 = arith.constant 0 : index
    %c0_205 = arith.constant 0 : index
    %370 = vector.load %arg4[%c0_203, %c0_204, %c0_205] : memref<1x16x16xf32, #tpu.memory_space<vmem>>, vector<1x16x16xf32>
    tpu.vector_store %arg4[%c0_203, %c0_204, %c0_205], %369 {strides = array<i32>} : memref<1x16x16xf32, #tpu.memory_space<vmem>>, vector<1x16x16xf32>,
    %c0_206 = arith.constant 0 : index
    %c9 = arith.constant 9 : index
    %c0_207 = arith.constant 0 : index
    %371 = vector.load %arg4[%c0_206, %c9, %c0_207] : memref<1x16x16xf32, #tpu.memory_space<vmem>>, vector<1x1x16xf32>
    %c0_208 = arith.constant 0 : index
    %c0_209 = arith.constant 0 : index
    %c9_210 = arith.constant 9 : index
    %372 = vector.load %arg4[%c0_208, %c0_209, %c9_210] : memref<1x16x16xf32, #tpu.memory_space<vmem>>, vector<1x16x1xf32>
    %c0_211 = arith.constant 0 : index
    %c9_212 = arith.constant 9 : index
    %c9_213 = arith.constant 9 : index
    %373 = vector.load %arg4[%c0_211, %c9_212, %c9_213] : memref<1x16x16xf32, #tpu.memory_space<vmem>>, vector<1x1x1xf32>
    %cst_214 = arith.constant 9.99999968E-21 : f32
    %374 = vector.broadcast %cst_214 : f32 to vector<1x1x1xf32>
    %375 = arith.maximumf %373, %374 : vector<1x1x1xf32>
    %376 = math.rsqrt %375 : vector<1x1x1xf32>
    %377 = vector.broadcast %376 : vector<1x1x1xf32> to vector<1x16x1xf32>
    %378 = arith.mulf %372, %377 : vector<1x16x1xf32>
    %c9_i32 = arith.constant 9 : i32
    %379 = vector.broadcast %c9_i32 : i32 to vector<16x1xi32>
    %380 = arith.cmpi sgt, %35, %379 : vector<16x1xi32>
    %cst_215 = arith.constant 0.000000e+00 : f32
    %381 = vector.shape_cast %380 : vector<16x1xi1> to vector<1x16x1xi1>
    %382 = vector.broadcast %cst_215 : f32 to vector<1x16x1xf32>
    %383 = arith.select %381, %378, %382 : vector<1x16x1xi1>, vector<1x16x1xf32>
    %c9_i32_216 = arith.constant 9 : i32
    %384 = vector.broadcast %c9_i32_216 : i32 to vector<1x16xi32>
    %385 = arith.cmpi sgt, %36, %384 : vector<1x16xi32>
    %386 = vector.broadcast %376 : vector<1x1x1xf32> to vector<1x1x16xf32>
    %387 = arith.mulf %371, %386 : vector<1x1x16xf32>
    %cst_217 = arith.constant 0.000000e+00 : f32
    %388 = vector.shape_cast %385 : vector<1x16xi1> to vector<1x1x16xi1>
    %389 = vector.broadcast %cst_217 : f32 to vector<1x1x16xf32>
    %390 = arith.select %388, %387, %389 : vector<1x1x16xi1>, vector<1x1x16xf32>
    %c9_i32_218 = arith.constant 9 : i32
    %391 = vector.broadcast %c9_i32_218 : i32 to vector<16x1xi32>
    %392 = arith.cmpi sge, %35, %391 : vector<16x1xi32>
    %cst_219 = arith.constant 0.000000e+00 : f32
    %393 = vector.shape_cast %392 : vector<16x1xi1> to vector<1x16x1xi1>
    %394 = vector.broadcast %cst_219 : f32 to vector<1x16x1xf32>
    %395 = arith.select %393, %378, %394 : vector<1x16x1xi1>, vector<1x16x1xf32>
    %c9_i32_220 = arith.constant 9 : i32
    %396 = vector.broadcast %c9_i32_220 : i32 to vector<16x16xi32>
    %397 = arith.cmpi eq, %37, %396 : vector<16x16xi32>
    %c0_221 = arith.constant 0 : index
    %c0_222 = arith.constant 0 : index
    %c0_223 = arith.constant 0 : index
    %398 = vector.load %arg4[%c0_221, %c0_222, %c0_223] : memref<1x16x16xf32, #tpu.memory_space<vmem>>, vector<1x16x16xf32>
    %399 = vector.broadcast %383 : vector<1x16x1xf32> to vector<1x16x16xf32>
    %400 = vector.broadcast %390 : vector<1x1x16xf32> to vector<1x16x16xf32>
    %401 = arith.mulf %399, %400 : vector<1x16x16xf32>
    %402 = arith.subf %398, %401 : vector<1x16x16xf32>
    %403 = vector.shape_cast %397 : vector<16x16xi1> to vector<1x16x16xi1>
    %404 = vector.shape_cast %395 : vector<1x16x1xf32> to vector<1x16x1xf32>
    %405 = vector.broadcast %404 : vector<1x16x1xf32> to vector<1x16x16xf32>
    %406 = arith.select %403, %405, %402 : vector<1x16x16xi1>, vector<1x16x16xf32>
    %c0_224 = arith.constant 0 : index
    %c0_225 = arith.constant 0 : index
    %c0_226 = arith.constant 0 : index
    %407 = vector.load %arg4[%c0_224, %c0_225, %c0_226] : memref<1x16x16xf32, #tpu.memory_space<vmem>>, vector<1x16x16xf32>
    tpu.vector_store %arg4[%c0_224, %c0_225, %c0_226], %406 {strides = array<i32>} : memref<1x16x16xf32, #tpu.memory_space<vmem>>, vector<1x16x16xf32>,
    %c0_227 = arith.constant 0 : index
    %c10 = arith.constant 10 : index
    %c0_228 = arith.constant 0 : index
    %408 = vector.load %arg4[%c0_227, %c10, %c0_228] : memref<1x16x16xf32, #tpu.memory_space<vmem>>, vector<1x1x16xf32>
    %c0_229 = arith.constant 0 : index
    %c0_230 = arith.constant 0 : index
    %c10_231 = arith.constant 10 : index
    %409 = vector.load %arg4[%c0_229, %c0_230, %c10_231] : memref<1x16x16xf32, #tpu.memory_space<vmem>>, vector<1x16x1xf32>
    %c0_232 = arith.constant 0 : index
    %c10_233 = arith.constant 10 : index
    %c10_234 = arith.constant 10 : index
    %410 = vector.load %arg4[%c0_232, %c10_233, %c10_234] : memref<1x16x16xf32, #tpu.memory_space<vmem>>, vector<1x1x1xf32>
    %cst_235 = arith.constant 9.99999968E-21 : f32
    %411 = vector.broadcast %cst_235 : f32 to vector<1x1x1xf32>
    %412 = arith.maximumf %410, %411 : vector<1x1x1xf32>
    %413 = math.rsqrt %412 : vector<1x1x1xf32>
    %414 = vector.broadcast %413 : vector<1x1x1xf32> to vector<1x16x1xf32>
    %415 = arith.mulf %409, %414 : vector<1x16x1xf32>
    %c10_i32 = arith.constant 10 : i32
    %416 = vector.broadcast %c10_i32 : i32 to vector<16x1xi32>
    %417 = arith.cmpi sgt, %35, %416 : vector<16x1xi32>
    %cst_236 = arith.constant 0.000000e+00 : f32
    %418 = vector.shape_cast %417 : vector<16x1xi1> to vector<1x16x1xi1>
    %419 = vector.broadcast %cst_236 : f32 to vector<1x16x1xf32>
    %420 = arith.select %418, %415, %419 : vector<1x16x1xi1>, vector<1x16x1xf32>
    %c10_i32_237 = arith.constant 10 : i32
    %421 = vector.broadcast %c10_i32_237 : i32 to vector<1x16xi32>
    %422 = arith.cmpi sgt, %36, %421 : vector<1x16xi32>
    %423 = vector.broadcast %413 : vector<1x1x1xf32> to vector<1x1x16xf32>
    %424 = arith.mulf %408, %423 : vector<1x1x16xf32>
    %cst_238 = arith.constant 0.000000e+00 : f32
    %425 = vector.shape_cast %422 : vector<1x16xi1> to vector<1x1x16xi1>
    %426 = vector.broadcast %cst_238 : f32 to vector<1x1x16xf32>
    %427 = arith.select %425, %424, %426 : vector<1x1x16xi1>, vector<1x1x16xf32>
    %c10_i32_239 = arith.constant 10 : i32
    %428 = vector.broadcast %c10_i32_239 : i32 to vector<16x1xi32>
    %429 = arith.cmpi sge, %35, %428 : vector<16x1xi32>
    %cst_240 = arith.constant 0.000000e+00 : f32
    %430 = vector.shape_cast %429 : vector<16x1xi1> to vector<1x16x1xi1>
    %431 = vector.broadcast %cst_240 : f32 to vector<1x16x1xf32>
    %432 = arith.select %430, %415, %431 : vector<1x16x1xi1>, vector<1x16x1xf32>
    %c10_i32_241 = arith.constant 10 : i32
    %433 = vector.broadcast %c10_i32_241 : i32 to vector<16x16xi32>
    %434 = arith.cmpi eq, %37, %433 : vector<16x16xi32>
    %c0_242 = arith.constant 0 : index
    %c0_243 = arith.constant 0 : index
    %c0_244 = arith.constant 0 : index
    %435 = vector.load %arg4[%c0_242, %c0_243, %c0_244] : memref<1x16x16xf32, #tpu.memory_space<vmem>>, vector<1x16x16xf32>
    %436 = vector.broadcast %420 : vector<1x16x1xf32> to vector<1x16x16xf32>
    %437 = vector.broadcast %427 : vector<1x1x16xf32> to vector<1x16x16xf32>
    %438 = arith.mulf %436, %437 : vector<1x16x16xf32>
    %439 = arith.subf %435, %438 : vector<1x16x16xf32>
    %440 = vector.shape_cast %434 : vector<16x16xi1> to vector<1x16x16xi1>
    %441 = vector.shape_cast %432 : vector<1x16x1xf32> to vector<1x16x1xf32>
    %442 = vector.broadcast %441 : vector<1x16x1xf32> to vector<1x16x16xf32>
    %443 = arith.select %440, %442, %439 : vector<1x16x16xi1>, vector<1x16x16xf32>
    %c0_245 = arith.constant 0 : index
    %c0_246 = arith.constant 0 : index
    %c0_247 = arith.constant 0 : index
    %444 = vector.load %arg4[%c0_245, %c0_246, %c0_247] : memref<1x16x16xf32, #tpu.memory_space<vmem>>, vector<1x16x16xf32>
    tpu.vector_store %arg4[%c0_245, %c0_246, %c0_247], %443 {strides = array<i32>} : memref<1x16x16xf32, #tpu.memory_space<vmem>>, vector<1x16x16xf32>,
    %c0_248 = arith.constant 0 : index
    %c11 = arith.constant 11 : index
    %c0_249 = arith.constant 0 : index
    %445 = vector.load %arg4[%c0_248, %c11, %c0_249] : memref<1x16x16xf32, #tpu.memory_space<vmem>>, vector<1x1x16xf32>
    %c0_250 = arith.constant 0 : index
    %c0_251 = arith.constant 0 : index
    %c11_252 = arith.constant 11 : index
    %446 = vector.load %arg4[%c0_250, %c0_251, %c11_252] : memref<1x16x16xf32, #tpu.memory_space<vmem>>, vector<1x16x1xf32>
    %c0_253 = arith.constant 0 : index
    %c11_254 = arith.constant 11 : index
    %c11_255 = arith.constant 11 : index
    %447 = vector.load %arg4[%c0_253, %c11_254, %c11_255] : memref<1x16x16xf32, #tpu.memory_space<vmem>>, vector<1x1x1xf32>
    %cst_256 = arith.constant 9.99999968E-21 : f32
    %448 = vector.broadcast %cst_256 : f32 to vector<1x1x1xf32>
    %449 = arith.maximumf %447, %448 : vector<1x1x1xf32>
    %450 = math.rsqrt %449 : vector<1x1x1xf32>
    %451 = vector.broadcast %450 : vector<1x1x1xf32> to vector<1x16x1xf32>
    %452 = arith.mulf %446, %451 : vector<1x16x1xf32>
    %c11_i32 = arith.constant 11 : i32
    %453 = vector.broadcast %c11_i32 : i32 to vector<16x1xi32>
    %454 = arith.cmpi sgt, %35, %453 : vector<16x1xi32>
    %cst_257 = arith.constant 0.000000e+00 : f32
    %455 = vector.shape_cast %454 : vector<16x1xi1> to vector<1x16x1xi1>
    %456 = vector.broadcast %cst_257 : f32 to vector<1x16x1xf32>
    %457 = arith.select %455, %452, %456 : vector<1x16x1xi1>, vector<1x16x1xf32>
    %c11_i32_258 = arith.constant 11 : i32
    %458 = vector.broadcast %c11_i32_258 : i32 to vector<1x16xi32>
    %459 = arith.cmpi sgt, %36, %458 : vector<1x16xi32>
    %460 = vector.broadcast %450 : vector<1x1x1xf32> to vector<1x1x16xf32>
    %461 = arith.mulf %445, %460 : vector<1x1x16xf32>
    %cst_259 = arith.constant 0.000000e+00 : f32
    %462 = vector.shape_cast %459 : vector<1x16xi1> to vector<1x1x16xi1>
    %463 = vector.broadcast %cst_259 : f32 to vector<1x1x16xf32>
    %464 = arith.select %462, %461, %463 : vector<1x1x16xi1>, vector<1x1x16xf32>
    %c11_i32_260 = arith.constant 11 : i32
    %465 = vector.broadcast %c11_i32_260 : i32 to vector<16x1xi32>
    %466 = arith.cmpi sge, %35, %465 : vector<16x1xi32>
    %cst_261 = arith.constant 0.000000e+00 : f32
    %467 = vector.shape_cast %466 : vector<16x1xi1> to vector<1x16x1xi1>
    %468 = vector.broadcast %cst_261 : f32 to vector<1x16x1xf32>
    %469 = arith.select %467, %452, %468 : vector<1x16x1xi1>, vector<1x16x1xf32>
    %c11_i32_262 = arith.constant 11 : i32
    %470 = vector.broadcast %c11_i32_262 : i32 to vector<16x16xi32>
    %471 = arith.cmpi eq, %37, %470 : vector<16x16xi32>
    %c0_263 = arith.constant 0 : index
    %c0_264 = arith.constant 0 : index
    %c0_265 = arith.constant 0 : index
    %472 = vector.load %arg4[%c0_263, %c0_264, %c0_265] : memref<1x16x16xf32, #tpu.memory_space<vmem>>, vector<1x16x16xf32>
    %473 = vector.broadcast %457 : vector<1x16x1xf32> to vector<1x16x16xf32>
    %474 = vector.broadcast %464 : vector<1x1x16xf32> to vector<1x16x16xf32>
    %475 = arith.mulf %473, %474 : vector<1x16x16xf32>
    %476 = arith.subf %472, %475 : vector<1x16x16xf32>
    %477 = vector.shape_cast %471 : vector<16x16xi1> to vector<1x16x16xi1>
    %478 = vector.shape_cast %469 : vector<1x16x1xf32> to vector<1x16x1xf32>
    %479 = vector.broadcast %478 : vector<1x16x1xf32> to vector<1x16x16xf32>
    %480 = arith.select %477, %479, %476 : vector<1x16x16xi1>, vector<1x16x16xf32>
    %c0_266 = arith.constant 0 : index
    %c0_267 = arith.constant 0 : index
    %c0_268 = arith.constant 0 : index
    %481 = vector.load %arg4[%c0_266, %c0_267, %c0_268] : memref<1x16x16xf32, #tpu.memory_space<vmem>>, vector<1x16x16xf32>
    tpu.vector_store %arg4[%c0_266, %c0_267, %c0_268], %480 {strides = array<i32>} : memref<1x16x16xf32, #tpu.memory_space<vmem>>, vector<1x16x16xf32>,
    %c0_269 = arith.constant 0 : index
    %c12 = arith.constant 12 : index
    %c0_270 = arith.constant 0 : index
    %482 = vector.load %arg4[%c0_269, %c12, %c0_270] : memref<1x16x16xf32, #tpu.memory_space<vmem>>, vector<1x1x16xf32>
    %c0_271 = arith.constant 0 : index
    %c0_272 = arith.constant 0 : index
    %c12_273 = arith.constant 12 : index
    %483 = vector.load %arg4[%c0_271, %c0_272, %c12_273] : memref<1x16x16xf32, #tpu.memory_space<vmem>>, vector<1x16x1xf32>
    %c0_274 = arith.constant 0 : index
    %c12_275 = arith.constant 12 : index
    %c12_276 = arith.constant 12 : index
    %484 = vector.load %arg4[%c0_274, %c12_275, %c12_276] : memref<1x16x16xf32, #tpu.memory_space<vmem>>, vector<1x1x1xf32>
    %cst_277 = arith.constant 9.99999968E-21 : f32
    %485 = vector.broadcast %cst_277 : f32 to vector<1x1x1xf32>
    %486 = arith.maximumf %484, %485 : vector<1x1x1xf32>
    %487 = math.rsqrt %486 : vector<1x1x1xf32>
    %488 = vector.broadcast %487 : vector<1x1x1xf32> to vector<1x16x1xf32>
    %489 = arith.mulf %483, %488 : vector<1x16x1xf32>
    %c12_i32 = arith.constant 12 : i32
    %490 = vector.broadcast %c12_i32 : i32 to vector<16x1xi32>
    %491 = arith.cmpi sgt, %35, %490 : vector<16x1xi32>
    %cst_278 = arith.constant 0.000000e+00 : f32
    %492 = vector.shape_cast %491 : vector<16x1xi1> to vector<1x16x1xi1>
    %493 = vector.broadcast %cst_278 : f32 to vector<1x16x1xf32>
    %494 = arith.select %492, %489, %493 : vector<1x16x1xi1>, vector<1x16x1xf32>
    %c12_i32_279 = arith.constant 12 : i32
    %495 = vector.broadcast %c12_i32_279 : i32 to vector<1x16xi32>
    %496 = arith.cmpi sgt, %36, %495 : vector<1x16xi32>
    %497 = vector.broadcast %487 : vector<1x1x1xf32> to vector<1x1x16xf32>
    %498 = arith.mulf %482, %497 : vector<1x1x16xf32>
    %cst_280 = arith.constant 0.000000e+00 : f32
    %499 = vector.shape_cast %496 : vector<1x16xi1> to vector<1x1x16xi1>
    %500 = vector.broadcast %cst_280 : f32 to vector<1x1x16xf32>
    %501 = arith.select %499, %498, %500 : vector<1x1x16xi1>, vector<1x1x16xf32>
    %c12_i32_281 = arith.constant 12 : i32
    %502 = vector.broadcast %c12_i32_281 : i32 to vector<16x1xi32>
    %503 = arith.cmpi sge, %35, %502 : vector<16x1xi32>
    %cst_282 = arith.constant 0.000000e+00 : f32
    %504 = vector.shape_cast %503 : vector<16x1xi1> to vector<1x16x1xi1>
    %505 = vector.broadcast %cst_282 : f32 to vector<1x16x1xf32>
    %506 = arith.select %504, %489, %505 : vector<1x16x1xi1>, vector<1x16x1xf32>
    %c12_i32_283 = arith.constant 12 : i32
    %507 = vector.broadcast %c12_i32_283 : i32 to vector<16x16xi32>
    %508 = arith.cmpi eq, %37, %507 : vector<16x16xi32>
    %c0_284 = arith.constant 0 : index
    %c0_285 = arith.constant 0 : index
    %c0_286 = arith.constant 0 : index
    %509 = vector.load %arg4[%c0_284, %c0_285, %c0_286] : memref<1x16x16xf32, #tpu.memory_space<vmem>>, vector<1x16x16xf32>
    %510 = vector.broadcast %494 : vector<1x16x1xf32> to vector<1x16x16xf32>
    %511 = vector.broadcast %501 : vector<1x1x16xf32> to vector<1x16x16xf32>
    %512 = arith.mulf %510, %511 : vector<1x16x16xf32>
    %513 = arith.subf %509, %512 : vector<1x16x16xf32>
    %514 = vector.shape_cast %508 : vector<16x16xi1> to vector<1x16x16xi1>
    %515 = vector.shape_cast %506 : vector<1x16x1xf32> to vector<1x16x1xf32>
    %516 = vector.broadcast %515 : vector<1x16x1xf32> to vector<1x16x16xf32>
    %517 = arith.select %514, %516, %513 : vector<1x16x16xi1>, vector<1x16x16xf32>
    %c0_287 = arith.constant 0 : index
    %c0_288 = arith.constant 0 : index
    %c0_289 = arith.constant 0 : index
    %518 = vector.load %arg4[%c0_287, %c0_288, %c0_289] : memref<1x16x16xf32, #tpu.memory_space<vmem>>, vector<1x16x16xf32>
    tpu.vector_store %arg4[%c0_287, %c0_288, %c0_289], %517 {strides = array<i32>} : memref<1x16x16xf32, #tpu.memory_space<vmem>>, vector<1x16x16xf32>,
    %c0_290 = arith.constant 0 : index
    %c13 = arith.constant 13 : index
    %c0_291 = arith.constant 0 : index
    %519 = vector.load %arg4[%c0_290, %c13, %c0_291] : memref<1x16x16xf32, #tpu.memory_space<vmem>>, vector<1x1x16xf32>
    %c0_292 = arith.constant 0 : index
    %c0_293 = arith.constant 0 : index
    %c13_294 = arith.constant 13 : index
    %520 = vector.load %arg4[%c0_292, %c0_293, %c13_294] : memref<1x16x16xf32, #tpu.memory_space<vmem>>, vector<1x16x1xf32>
    %c0_295 = arith.constant 0 : index
    %c13_296 = arith.constant 13 : index
    %c13_297 = arith.constant 13 : index
    %521 = vector.load %arg4[%c0_295, %c13_296, %c13_297] : memref<1x16x16xf32, #tpu.memory_space<vmem>>, vector<1x1x1xf32>
    %cst_298 = arith.constant 9.99999968E-21 : f32
    %522 = vector.broadcast %cst_298 : f32 to vector<1x1x1xf32>
    %523 = arith.maximumf %521, %522 : vector<1x1x1xf32>
    %524 = math.rsqrt %523 : vector<1x1x1xf32>
    %525 = vector.broadcast %524 : vector<1x1x1xf32> to vector<1x16x1xf32>
    %526 = arith.mulf %520, %525 : vector<1x16x1xf32>
    %c13_i32 = arith.constant 13 : i32
    %527 = vector.broadcast %c13_i32 : i32 to vector<16x1xi32>
    %528 = arith.cmpi sgt, %35, %527 : vector<16x1xi32>
    %cst_299 = arith.constant 0.000000e+00 : f32
    %529 = vector.shape_cast %528 : vector<16x1xi1> to vector<1x16x1xi1>
    %530 = vector.broadcast %cst_299 : f32 to vector<1x16x1xf32>
    %531 = arith.select %529, %526, %530 : vector<1x16x1xi1>, vector<1x16x1xf32>
    %c13_i32_300 = arith.constant 13 : i32
    %532 = vector.broadcast %c13_i32_300 : i32 to vector<1x16xi32>
    %533 = arith.cmpi sgt, %36, %532 : vector<1x16xi32>
    %534 = vector.broadcast %524 : vector<1x1x1xf32> to vector<1x1x16xf32>
    %535 = arith.mulf %519, %534 : vector<1x1x16xf32>
    %cst_301 = arith.constant 0.000000e+00 : f32
    %536 = vector.shape_cast %533 : vector<1x16xi1> to vector<1x1x16xi1>
    %537 = vector.broadcast %cst_301 : f32 to vector<1x1x16xf32>
    %538 = arith.select %536, %535, %537 : vector<1x1x16xi1>, vector<1x1x16xf32>
    %c13_i32_302 = arith.constant 13 : i32
    %539 = vector.broadcast %c13_i32_302 : i32 to vector<16x1xi32>
    %540 = arith.cmpi sge, %35, %539 : vector<16x1xi32>
    %cst_303 = arith.constant 0.000000e+00 : f32
    %541 = vector.shape_cast %540 : vector<16x1xi1> to vector<1x16x1xi1>
    %542 = vector.broadcast %cst_303 : f32 to vector<1x16x1xf32>
    %543 = arith.select %541, %526, %542 : vector<1x16x1xi1>, vector<1x16x1xf32>
    %c13_i32_304 = arith.constant 13 : i32
    %544 = vector.broadcast %c13_i32_304 : i32 to vector<16x16xi32>
    %545 = arith.cmpi eq, %37, %544 : vector<16x16xi32>
    %c0_305 = arith.constant 0 : index
    %c0_306 = arith.constant 0 : index
    %c0_307 = arith.constant 0 : index
    %546 = vector.load %arg4[%c0_305, %c0_306, %c0_307] : memref<1x16x16xf32, #tpu.memory_space<vmem>>, vector<1x16x16xf32>
    %547 = vector.broadcast %531 : vector<1x16x1xf32> to vector<1x16x16xf32>
    %548 = vector.broadcast %538 : vector<1x1x16xf32> to vector<1x16x16xf32>
    %549 = arith.mulf %547, %548 : vector<1x16x16xf32>
    %550 = arith.subf %546, %549 : vector<1x16x16xf32>
    %551 = vector.shape_cast %545 : vector<16x16xi1> to vector<1x16x16xi1>
    %552 = vector.shape_cast %543 : vector<1x16x1xf32> to vector<1x16x1xf32>
    %553 = vector.broadcast %552 : vector<1x16x1xf32> to vector<1x16x16xf32>
    %554 = arith.select %551, %553, %550 : vector<1x16x16xi1>, vector<1x16x16xf32>
    %c0_308 = arith.constant 0 : index
    %c0_309 = arith.constant 0 : index
    %c0_310 = arith.constant 0 : index
    %555 = vector.load %arg4[%c0_308, %c0_309, %c0_310] : memref<1x16x16xf32, #tpu.memory_space<vmem>>, vector<1x16x16xf32>
    tpu.vector_store %arg4[%c0_308, %c0_309, %c0_310], %554 {strides = array<i32>} : memref<1x16x16xf32, #tpu.memory_space<vmem>>, vector<1x16x16xf32>,
    %c0_311 = arith.constant 0 : index
    %c14 = arith.constant 14 : index
    %c0_312 = arith.constant 0 : index
    %556 = vector.load %arg4[%c0_311, %c14, %c0_312] : memref<1x16x16xf32, #tpu.memory_space<vmem>>, vector<1x1x16xf32>
    %c0_313 = arith.constant 0 : index
    %c0_314 = arith.constant 0 : index
    %c14_315 = arith.constant 14 : index
    %557 = vector.load %arg4[%c0_313, %c0_314, %c14_315] : memref<1x16x16xf32, #tpu.memory_space<vmem>>, vector<1x16x1xf32>
    %c0_316 = arith.constant 0 : index
    %c14_317 = arith.constant 14 : index
    %c14_318 = arith.constant 14 : index
    %558 = vector.load %arg4[%c0_316, %c14_317, %c14_318] : memref<1x16x16xf32, #tpu.memory_space<vmem>>, vector<1x1x1xf32>
    %cst_319 = arith.constant 9.99999968E-21 : f32
    %559 = vector.broadcast %cst_319 : f32 to vector<1x1x1xf32>
    %560 = arith.maximumf %558, %559 : vector<1x1x1xf32>
    %561 = math.rsqrt %560 : vector<1x1x1xf32>
    %562 = vector.broadcast %561 : vector<1x1x1xf32> to vector<1x16x1xf32>
    %563 = arith.mulf %557, %562 : vector<1x16x1xf32>
    %c14_i32 = arith.constant 14 : i32
    %564 = vector.broadcast %c14_i32 : i32 to vector<16x1xi32>
    %565 = arith.cmpi sgt, %35, %564 : vector<16x1xi32>
    %cst_320 = arith.constant 0.000000e+00 : f32
    %566 = vector.shape_cast %565 : vector<16x1xi1> to vector<1x16x1xi1>
    %567 = vector.broadcast %cst_320 : f32 to vector<1x16x1xf32>
    %568 = arith.select %566, %563, %567 : vector<1x16x1xi1>, vector<1x16x1xf32>
    %c14_i32_321 = arith.constant 14 : i32
    %569 = vector.broadcast %c14_i32_321 : i32 to vector<1x16xi32>
    %570 = arith.cmpi sgt, %36, %569 : vector<1x16xi32>
    %571 = vector.broadcast %561 : vector<1x1x1xf32> to vector<1x1x16xf32>
    %572 = arith.mulf %556, %571 : vector<1x1x16xf32>
    %cst_322 = arith.constant 0.000000e+00 : f32
    %573 = vector.shape_cast %570 : vector<1x16xi1> to vector<1x1x16xi1>
    %574 = vector.broadcast %cst_322 : f32 to vector<1x1x16xf32>
    %575 = arith.select %573, %572, %574 : vector<1x1x16xi1>, vector<1x1x16xf32>
    %c14_i32_323 = arith.constant 14 : i32
    %576 = vector.broadcast %c14_i32_323 : i32 to vector<16x1xi32>
    %577 = arith.cmpi sge, %35, %576 : vector<16x1xi32>
    %cst_324 = arith.constant 0.000000e+00 : f32
    %578 = vector.shape_cast %577 : vector<16x1xi1> to vector<1x16x1xi1>
    %579 = vector.broadcast %cst_324 : f32 to vector<1x16x1xf32>
    %580 = arith.select %578, %563, %579 : vector<1x16x1xi1>, vector<1x16x1xf32>
    %c14_i32_325 = arith.constant 14 : i32
    %581 = vector.broadcast %c14_i32_325 : i32 to vector<16x16xi32>
    %582 = arith.cmpi eq, %37, %581 : vector<16x16xi32>
    %c0_326 = arith.constant 0 : index
    %c0_327 = arith.constant 0 : index
    %c0_328 = arith.constant 0 : index
    %583 = vector.load %arg4[%c0_326, %c0_327, %c0_328] : memref<1x16x16xf32, #tpu.memory_space<vmem>>, vector<1x16x16xf32>
    %584 = vector.broadcast %568 : vector<1x16x1xf32> to vector<1x16x16xf32>
    %585 = vector.broadcast %575 : vector<1x1x16xf32> to vector<1x16x16xf32>
    %586 = arith.mulf %584, %585 : vector<1x16x16xf32>
    %587 = arith.subf %583, %586 : vector<1x16x16xf32>
    %588 = vector.shape_cast %582 : vector<16x16xi1> to vector<1x16x16xi1>
    %589 = vector.shape_cast %580 : vector<1x16x1xf32> to vector<1x16x1xf32>
    %590 = vector.broadcast %589 : vector<1x16x1xf32> to vector<1x16x16xf32>
    %591 = arith.select %588, %590, %587 : vector<1x16x16xi1>, vector<1x16x16xf32>
    %c0_329 = arith.constant 0 : index
    %c0_330 = arith.constant 0 : index
    %c0_331 = arith.constant 0 : index
    %592 = vector.load %arg4[%c0_329, %c0_330, %c0_331] : memref<1x16x16xf32, #tpu.memory_space<vmem>>, vector<1x16x16xf32>
    tpu.vector_store %arg4[%c0_329, %c0_330, %c0_331], %591 {strides = array<i32>} : memref<1x16x16xf32, #tpu.memory_space<vmem>>, vector<1x16x16xf32>,
    %c0_332 = arith.constant 0 : index
    %c15 = arith.constant 15 : index
    %c0_333 = arith.constant 0 : index
    %593 = vector.load %arg4[%c0_332, %c15, %c0_333] : memref<1x16x16xf32, #tpu.memory_space<vmem>>, vector<1x1x16xf32>
    %c0_334 = arith.constant 0 : index
    %c0_335 = arith.constant 0 : index
    %c15_336 = arith.constant 15 : index
    %594 = vector.load %arg4[%c0_334, %c0_335, %c15_336] : memref<1x16x16xf32, #tpu.memory_space<vmem>>, vector<1x16x1xf32>
    %c0_337 = arith.constant 0 : index
    %c15_338 = arith.constant 15 : index
    %c15_339 = arith.constant 15 : index
    %595 = vector.load %arg4[%c0_337, %c15_338, %c15_339] : memref<1x16x16xf32, #tpu.memory_space<vmem>>, vector<1x1x1xf32>
    %cst_340 = arith.constant 9.99999968E-21 : f32
    %596 = vector.broadcast %cst_340 : f32 to vector<1x1x1xf32>
    %597 = arith.maximumf %595, %596 : vector<1x1x1xf32>
    %598 = math.rsqrt %597 : vector<1x1x1xf32>
    %599 = vector.broadcast %598 : vector<1x1x1xf32> to vector<1x16x1xf32>
    %600 = arith.mulf %594, %599 : vector<1x16x1xf32>
    %c15_i32 = arith.constant 15 : i32
    %601 = vector.broadcast %c15_i32 : i32 to vector<16x1xi32>
    %602 = arith.cmpi sgt, %35, %601 : vector<16x1xi32>
    %cst_341 = arith.constant 0.000000e+00 : f32
    %603 = vector.shape_cast %602 : vector<16x1xi1> to vector<1x16x1xi1>
    %604 = vector.broadcast %cst_341 : f32 to vector<1x16x1xf32>
    %605 = arith.select %603, %600, %604 : vector<1x16x1xi1>, vector<1x16x1xf32>
    %c15_i32_342 = arith.constant 15 : i32
    %606 = vector.broadcast %c15_i32_342 : i32 to vector<1x16xi32>
    %607 = arith.cmpi sgt, %36, %606 : vector<1x16xi32>
    %608 = vector.broadcast %598 : vector<1x1x1xf32> to vector<1x1x16xf32>
    %609 = arith.mulf %593, %608 : vector<1x1x16xf32>
    %cst_343 = arith.constant 0.000000e+00 : f32
    %610 = vector.shape_cast %607 : vector<1x16xi1> to vector<1x1x16xi1>
    %611 = vector.broadcast %cst_343 : f32 to vector<1x1x16xf32>
    %612 = arith.select %610, %609, %611 : vector<1x1x16xi1>, vector<1x1x16xf32>
    %c15_i32_344 = arith.constant 15 : i32
    %613 = vector.broadcast %c15_i32_344 : i32 to vector<16x1xi32>
    %614 = arith.cmpi sge, %35, %613 : vector<16x1xi32>
    %cst_345 = arith.constant 0.000000e+00 : f32
    %615 = vector.shape_cast %614 : vector<16x1xi1> to vector<1x16x1xi1>
    %616 = vector.broadcast %cst_345 : f32 to vector<1x16x1xf32>
    %617 = arith.select %615, %600, %616 : vector<1x16x1xi1>, vector<1x16x1xf32>
    %c15_i32_346 = arith.constant 15 : i32
    %618 = vector.broadcast %c15_i32_346 : i32 to vector<16x16xi32>
    %619 = arith.cmpi eq, %37, %618 : vector<16x16xi32>
    %c0_347 = arith.constant 0 : index
    %c0_348 = arith.constant 0 : index
    %c0_349 = arith.constant 0 : index
    %620 = vector.load %arg4[%c0_347, %c0_348, %c0_349] : memref<1x16x16xf32, #tpu.memory_space<vmem>>, vector<1x16x16xf32>
    %621 = vector.broadcast %605 : vector<1x16x1xf32> to vector<1x16x16xf32>
    %622 = vector.broadcast %612 : vector<1x1x16xf32> to vector<1x16x16xf32>
    %623 = arith.mulf %621, %622 : vector<1x16x16xf32>
    %624 = arith.subf %620, %623 : vector<1x16x16xf32>
    %625 = vector.shape_cast %619 : vector<16x16xi1> to vector<1x16x16xi1>
    %626 = vector.shape_cast %617 : vector<1x16x1xf32> to vector<1x16x1xf32>
    %627 = vector.broadcast %626 : vector<1x16x1xf32> to vector<1x16x16xf32>
    %628 = arith.select %625, %627, %624 : vector<1x16x16xi1>, vector<1x16x16xf32>
    %c0_350 = arith.constant 0 : index
    %c0_351 = arith.constant 0 : index
    %c0_352 = arith.constant 0 : index
    %629 = vector.load %arg4[%c0_350, %c0_351, %c0_352] : memref<1x16x16xf32, #tpu.memory_space<vmem>>, vector<1x16x16xf32>
    tpu.vector_store %arg4[%c0_350, %c0_351, %c0_352], %628 {strides = array<i32>} : memref<1x16x16xf32, #tpu.memory_space<vmem>>, vector<1x16x16xf32>,
    %c0_353 = arith.constant 0 : index
    %c0_354 = arith.constant 0 : index
    %c0_355 = arith.constant 0 : index
    %630 = vector.load %arg4[%c0_353, %c0_354, %c0_355] : memref<1x16x16xf32, #tpu.memory_space<vmem>>, vector<1x16x16xf32>
    %631 = vector.shape_cast %630 : vector<1x16x16xf32> to vector<16x16xf32>
    %c0_356 = arith.constant 0 : index
    %c0_357 = arith.constant 0 : index
    %632 = vector.load %arg3[%c0_356, %c0_357] : memref<16x16xf32, #tpu.memory_space<vmem>>, vector<16x16xf32>
    tpu.vector_store %arg3[%c0_356, %c0_357], %631 {strides = array<i32>} : memref<16x16xf32, #tpu.memory_space<vmem>>, vector<16x16xf32>,
    return
  }
  func.func @transform_0(%arg0: i32) -> (i32, i32) {
    %c0_i32 = arith.constant 0 : i32
    %c0_i32_0 = arith.constant 0 : i32
    %c0_i32_1 = arith.constant 0 : i32
    return %c0_i32, %c0_i32_0 : i32, i32
  }
  func.func @transform_1(%arg0: i32) -> (i32, i32) {
    %c0_i32 = arith.constant 0 : i32
    %c0_i32_0 = arith.constant 0 : i32
    %c0_i32_1 = arith.constant 0 : i32
    return %c0_i32, %c0_i32_0 : i32, i32
  }
  func.func @transform_2(%arg0: i32) -> (i32, i32) {
    %c0_i32 = arith.constant 0 : i32
    %c0_i32_0 = arith.constant 0 : i32
    %c0_i32_1 = arith.constant 0 : i32
    return %c0_i32, %c0_i32_0 : i32, i32
  }
}

</mosaic_0001>

<bundles_post_ra>
// kernel: tpu_custom_call.1
= control target key start
LH: loop header
LB: loop body
LE: loop exit
PB: predicated region body
PF: predicated region fallthrough
CT: control target
= control target key end

     0   :  { %vm17_vm0 = vcmask 31744   ;;  %s1655_s0 = inlined_call_operand.vmem [shape: f32[16,4], index: 0, kind: input, shape index: {}]   ;;  %s1656_s1 = inlined_call_operand.vmem [shape: f32[4,16], index: 1, kind: input, shape index: {}]   ;;  %s1657_s2 = inlined_call_operand.hbm [shape: f32[16,16], index: 2, kind: output, shape index: {}]  }
   0x1   :  { %v12_v0 = vld [vmem:[%s1655_s0] sm:$0xff]  ;;  %v13_v1 = vld [vmem:[%s1655_s0 + $0x8] sm:$0xff] }
   0x2   :  { %7 = vsyncpa [#allocation4], 0  ;;  %v1137_v2 = vpack.c.bf16 %v13_v1, %v12_v0  ;;  %1134 = vmatprep.mubr.msk.f32.mxu0 %vm17_vm0, %v12_v0  ;;  %v15_v3 = vmul.f32 %v12_v0, %v12_v0  ;;  %v1279_v5 = vmov 0   ;;  %v14_v6 = vld [vmem:[%s1656_s1] sm:$0xf]  ;;  %vm25_vm2 = vcmask 125952  }
   0x3   :  { %vm1138_vm1 = vmpackc.low %vm17_vm0, %vm17_vm0  ;;  %1163 = vset.pattern.permute.xlu0 %v1279_v5  ;;  %1164 = vset.pattern.permute.xlu1 %v1279_v5  ;;  %v24_v7 = vmul.f32 %v14_v6, %v14_v6  ;;  %v122_v23 = vlaneseq  ;;  %v1280_v27 = vmov 0.0   ;;  %vm139_vm4 = vcmask 130048   ;;  %s1296_s1 = smov [#allocation3]  }
   0x4   :  { %1139 = vmatprep.subr.msk.bf16.mxu0 %vm1138_vm1, %v1137_v2  ;;  %v18_v4 = vsel %vm17_vm0, %v15_v3, 0.0  ;;  %v1281_v39 = vmov 1   ;;  %v16_v40 = vmul.f32 %v13_v1, %v13_v1  ;;  %s1111_s14 = sshll.u32 %s1296_s1, 4  ;;  %s1112_s14 = int_to_ptr.vmem [resolvable:$true] %s1111_s14 }
   0x5   :  { %1142 = vmatpush3.bf16.xpose.msk.msra.mxu0 %vm1138_vm1, %v1137_v2  ;;  %19 = vadd.xlane.f32.xlu0 %v18_v4  ;;  %v26_v8 = vsel %vm25_vm2, %v24_v7, 0.0  ;;  %v1335_v25 = vshrl.u32 %v122_v23, 7  ;;  %v1337_v26 = vand.u32 127, %v122_v23  ;;  %s1255_s15 = scalar_lea.vmem %s1112_s14, 256  ;;  %p1260_p1 = scmp.lt.s32.totalorder %s1112_s14, %s1112_s14 }
   0x6   :  { %v27_v9 = vrot.slane %v26_v8, 4  ;;  %v21_v41 = vsel %vm17_vm0, %v16_v40, 0.0  ;;  %p1256_p0 = scmp.ne.s32.totalorder %s1112_s14, %s1255_s15  ;;  %p1261_p2 = scmp.lt.s32.totalorder %s1255_s15, %s1255_s15 }
   0x7   :  { %vm133_vm3 = vcmp.eq.s32.totalorder %v1335_v25, %v1337_v26  ;;  %v1344_v33 = vsub.s32 0, %v1335_v25  ;;  %vm153_vm5 = vcmp.gt.s32.totalorder %v1335_v25, 0  ;;  %vm157_vm6 = vcmp.gt.s32.totalorder %v1337_v26, 0 }
   0x8   :  { %v28_v10 = vadd.f32 %v27_v9, %v26_v8  ;;  %v135_v28 = vsel %vm133_vm3, 0.0001, %v1280_v27  ;;  %vm169_vm7 = vcmp.eq.s32.totalorder %v1337_v26, 0  ;;  %vm213_vm8 = vcmp.gt.s32.totalorder %v1335_v25, 1  ;;  %p1262_p3 = por %p1261_p2, %p1260_p1 }
   0x9   :  { %vm225_vm9 = vcmp.ge.s32.totalorder %v1335_v25, 1  ;;  %v1371_v2 = vadd.s32 8, %v1335_v25  ;;  %v1282_v8 = vmov 2   ;;  %vm217_vm11 = vcmp.gt.s32.totalorder %v1337_v26, 1 }
   0xa   :  { %v29_v11 = vrot.slane %v28_v10, 2  ;;  %vm229_vm12 = vcmp.eq.s32.totalorder %v1337_v26, 1  ;;  %vm273_vm13 = vcmp.gt.s32.totalorder %v1335_v25, 2  ;;  %vm285_vm14 = vcmp.ge.s32.totalorder %v1335_v25, 2  ;;  %p1263_p4 = pnand %p1262_p3, %p1256_p0 }
   0xb   :  { %vm134_vm10 = vcmp.eq.s32.totalorder %v1371_v2, %v1337_v26  ;;  %vm277_vm15 = vcmp.gt.s32.totalorder %v1337_v26, 2  ;;  %vm333_vm1 = vcmp.gt.s32.totalorder %v1335_v25, 3  ;;  %vm345_vm2 = vcmp.ge.s32.totalorder %v1335_v25, 3 }
   0xc   :  { %1135 = vmatmul.mubr.msk.f32.vlgmr.msra.gmra.mrb[0].mxu0 %vm17_vm0, %v13_v1  ;;  %v30_v12 = vadd.f32 %v29_v11, %v28_v10  ;;  %v136_v3 = vsel %vm134_vm10, 0.0001, %v1280_v27  ;;  %vm289_vm0 = vcmp.eq.s32.totalorder %v1337_v26, 2  ;;  %vm337_vm3 = vcmp.gt.s32.totalorder %v1337_v26, 3 }
   0xd   :  { %vm453_vm10 = vcmp.gt.s32.totalorder %v1335_v25, 5 }
   0xe   :  { %v31_v13 = vrot.slane %v30_v12, 1 }
  0x10   :  { %v1330_v14 = vadd.f32 %v31_v13, %v30_v12 }
  0x92   :  { %v20_v15 = vpop.xlane.xlu0 %19 }
  0x93   :  { %v114_v17 = vadd.f32 %v1330_v14, %v20_v15 }
  0xdf   :  { %v1332_v16 = vpop.f32.mrb[0].mxu0 }
  0xe0   :  { %v105_v18 = vpop.f32.mrb[1].mxu0  ;;  %v117_v60 = vmul.f32 2.0, %v1332_v16 }
  0xe1   :  { %v116_v19 = vmul.f32 2.0, %v105_v18 }
  0xe3   :  { %v118_v20 = vsub.f32 %v114_v17, %v116_v19 }
  0xe5   :  { %v120_v21 = vmax.f32 %v118_v20, 0.0 }
  0xe7   :  { %v127_v22 = vmul.f32 -0.5, %v120_v21 }
  0xe9   :  { %v129_v24 = vmul.f32 1.442695, %v127_v22 }
  0xeb   :  { %1219 = vpow2.f32 %v129_v24 }
  0xf5   :  { %v1220_v29 = vpop.eup %1219 }
  0xf6   :  { %v137_v30 = vadd.f32 %v1220_v29, %v135_v28 }
  0xf8   :  { %140 = vst.msk [vmem:[#allocation2] sm:$0xff] %vm139_vm4, %v137_v30 }
  0xff   :  { %v142_v31 = vld [vmem:[#allocation2] sm:$0x1] }
 0x100   :  { %v145_v32 = vmax.f32 %v142_v31, 1e-20  ;;  %v143_v36 = vld [vmem:[#allocation2] sm:$0xff] }
 0x102   :  { %1221 = vrsqrt.f32 %v145_v32 }
 0x10c   :  { %v1222_v34 = vpop.eup %1221 }
 0x10d   :  { %160 = vperm.xlu0 %1163, %v1222_v34   ;;  %v150_v35 = vrot.slane %v1222_v34, %v1344_v33 }
 0x10f   :  { %v151_v37 = vmul.f32 %v150_v35, %v143_v36 }
 0x111   :  { %190 = vperm.xlu1 %1164, %v151_v37   ;;  %v155_v38 = vsel %vm153_vm5, %v151_v37, 0.0  ;;  %1166 = vset.pattern.permute.xlu0 %v1281_v39  ;;  %v1283_v37 = vmov 3   ;;  %vm349_vm5 = vcmp.eq.s32.totalorder %v1337_v26, 3 }
 0x115   :  { %172 = vperm.xlu1 %1164, %v155_v38  }
 0x119   :  { %1165 = vset.pattern.permute.xlu1 %v1281_v39 }
 0x139   :  { %22 = vadd.xlane.f32.xlu1 %v21_v41 }
 0x18c   :  { %v161_v42 = vpop.permute.xlu0 %160 }
 0x18d   :  { %v163_v43 = vmul.f32 %v161_v42, %v142_v31 }
 0x18f   :  { %v164_v44 = vsel %vm157_vm6, %v163_v43, 0.0  ;;  %vm393_vm6 = vcmp.gt.s32.totalorder %v1335_v25, 4 }
 0x190   :  { %v191_v45 = vpop.permute.xlu1 %190  ;;  %v1353_v46 = vrot.slane %v164_v44, %v1344_v33 }
 0x194   :  { %v173_v47 = vpop.permute.xlu1 %172 }
 0x195   :  { %v184_v48 = vmul.f32 %v1353_v46, %v173_v47 }
 0x197   :  { %v186_v49 = vsub.f32 %v143_v36, %v184_v48 }
 0x199   :  { %v198_v50 = vsel %vm169_vm7, %v191_v45, %v186_v49 }
 0x19a   :  { %200 = vst.msk [vmem:[#allocation2] sm:$0xff] %vm139_vm4, %v198_v50 }
 0x1a1   :  { %v202_v51 = vld [vmem:[#allocation2 + $0x1] sm:$0x1] }
 0x1a2   :  { %v205_v52 = vmax.f32 %v202_v51, 1e-20  ;;  %v203_v55 = vld [vmem:[#allocation2] sm:$0xff] }
 0x1a4   :  { %1223 = vrsqrt.f32 %v205_v52 }
 0x1ae   :  { %v1224_v53 = vpop.eup %1223 }
 0x1af   :  { %220 = vperm.xlu1 %1165, %v1224_v53   ;;  %v1361_v54 = vrot.slane %v1224_v53, %v1344_v33 }
 0x1b1   :  { %v211_v56 = vmul.f32 %v1361_v54, %v203_v55 }
 0x1b3   :  { %v215_v57 = vsel %vm213_vm8, %v211_v56, 0.0  ;;  %1168 = vset.pattern.permute.xlu1 %v1279_v5  ;;  %v227_v58 = vsel %vm225_vm9, %v211_v56, 0.0  ;;  %vm397_vm8 = vcmp.gt.s32.totalorder %v1337_v26, 4  ;;  %vm409_vm9 = vcmp.eq.s32.totalorder %v1337_v26, 4 }
 0x1b4   :  { %232 = vperm.xlu0 %1166, %v215_v57  }
 0x1b8   :  { %250 = vperm.xlu0 %1166, %v227_v58  }
 0x1bc   :  { %1167 = vset.pattern.permute.xlu0 %v1279_v5 }
 0x1c6   :  { %v23_v59 = vpop.xlane.xlu1 %22 }
 0x1c7   :  { %v115_v61 = vadd.f32 %v1330_v14, %v23_v59 }
 0x1c9   :  { %v119_v62 = vsub.f32 %v115_v61, %v117_v60 }
 0x1cb   :  { %v121_v63 = vmax.f32 %v119_v62, 0.0 }
 0x1cd   :  { %v128_v0 = vmul.f32 -0.5, %v121_v63 }
 0x1cf   :  { %v131_v1 = vmul.f32 1.442695, %v128_v0 }
 0x1d1   :  { %1225 = vpow2.f32 %v131_v1 }
 0x1db   :  { %v1226_v4 = vpop.eup %1225 }
 0x1dc   :  { %v138_v5 = vadd.f32 %v1226_v4, %v136_v3 }
 0x1de   :  { %141 = vst.msk [vmem:[#allocation2 + $0x8] sm:$0xff] %vm139_vm4, %v138_v5 }
 0x1e5   :  { %v144_v6 = vld [vmem:[#allocation2 + $0x8] sm:$0xff] }
 0x1e6   :  { %v152_v7 = vmul.f32 %v150_v35, %v144_v6 }
 0x1e8   :  { %195 = vperm.xlu1 %1168, %v152_v7   ;;  %177 = vperm.xlu0 %1167, %v152_v7  }
 0x1ec   :  { %1169 = vset.pattern.permute.xlu1 %v1282_v8  ;;  %1170 = vset.pattern.permute.xlu0 %v1281_v39 }
 0x22e   :  { %v221_v9 = vpop.permute.xlu1 %220 }
 0x22f   :  { %v223_v10 = vmul.f32 %v221_v9, %v202_v51 }
 0x231   :  { %v224_v11 = vsel %vm217_vm11, %v223_v10, 0.0  ;;  %vm465_vm11 = vcmp.ge.s32.totalorder %v1335_v25, 5 }
 0x232   :  { %v243_v12 = vrot.slane %v224_v11, %v1344_v33 }
 0x233   :  { %v233_v13 = vpop.permute.xlu0 %232 }
 0x234   :  { %v244_v14 = vmul.f32 %v243_v12, %v233_v13  ;;  %v1284_v13 = vmov 4  }
 0x236   :  { %v246_v15 = vsub.f32 %v203_v55, %v244_v14 }
 0x237   :  { %v251_v16 = vpop.permute.xlu0 %250 }
 0x238   :  { %v258_v17 = vsel %vm229_vm12, %v251_v16, %v246_v15 }
 0x239   :  { %260 = vst.msk [vmem:[#allocation2] sm:$0xff] %vm139_vm4, %v258_v17 }
 0x240   :  { %v262_v18 = vld [vmem:[#allocation2 + $0x2] sm:$0x1] }
 0x241   :  { %v265_v19 = vmax.f32 %v262_v18, 1e-20  ;;  %v263_v22 = vld [vmem:[#allocation2] sm:$0xff] }
 0x243   :  { %1227 = vrsqrt.f32 %v265_v19 }
 0x24d   :  { %v1228_v20 = vpop.eup %1227 }
 0x24e   :  { %280 = vperm.xlu1 %1169, %v1228_v20   ;;  %v270_v21 = vrot.slane %v1228_v20, %v1344_v33 }
 0x250   :  { %v271_v23 = vmul.f32 %v270_v21, %v263_v22 }
 0x252   :  { %v275_v24 = vsel %vm273_vm13, %v271_v23, 0.0  ;;  %v287_v36 = vsel %vm285_vm14, %v271_v23, 0.0  ;;  %vm469_vm13 = vcmp.eq.s32.totalorder %v1337_v26, 5  ;;  %vm513_vm14 = vcmp.gt.s32.totalorder %v1335_v25, 6 }
 0x253   :  { %292 = vperm.xlu1 %1169, %v275_v24  }
 0x257   :  { %1171 = vset.pattern.permute.xlu1 %v1281_v39 }
 0x267   :  { %v178_v28 = vpop.permute.xlu0 %177  ;;  %v196_v31 = vpop.permute.xlu1 %195 }
 0x268   :  { %v185_v29 = vmul.f32 %v1353_v46, %v178_v28 }
 0x26a   :  { %v187_v30 = vsub.f32 %v144_v6, %v185_v29 }
 0x26c   :  { %v199_v32 = vsel %vm169_vm7, %v196_v31, %v187_v30  ;;  %vm405_vm7 = vcmp.ge.s32.totalorder %v1335_v25, 4 }
 0x26d   :  { %201 = vst.msk [vmem:[#allocation2 + $0x8] sm:$0xff] %vm139_vm4, %v199_v32 }
 0x274   :  { %v204_v34 = vld [vmem:[#allocation2 + $0x8] sm:$0xff] }
 0x275   :  { %v212_v35 = vmul.f32 %v1361_v54, %v204_v34 }
 0x277   :  { %255 = vperm.xlu1 %1171, %v212_v35   ;;  %237 = vperm.xlu0 %1170, %v212_v35   ;;  %v1285_v35 = vmov 5  }
 0x27b   :  { %1172 = vset.pattern.permute.xlu0 %v1282_v8  ;;  %1173 = vset.pattern.permute.xlu1 %v1282_v8 }
 0x27c   :  { %310 = vperm.xlu0 %1172, %v287_v36  }
 0x280   :  { %1174 = vset.pattern.permute.xlu0 %v1283_v37 }
 0x2cd   :  { %v281_v38 = vpop.permute.xlu1 %280 }
 0x2ce   :  { %v283_v39 = vmul.f32 %v281_v38, %v262_v18 }
 0x2d0   :  { %v284_v40 = vsel %vm277_vm15, %v283_v39, 0.0  ;;  %vm525_vm15 = vcmp.ge.s32.totalorder %v1335_v25, 6 }
 0x2d1   :  { %v303_v41 = vrot.slane %v284_v40, %v1344_v33 }
 0x2d2   :  { %v293_v42 = vpop.permute.xlu1 %292 }
 0x2d3   :  { %v304_v43 = vmul.f32 %v303_v41, %v293_v42 }
 0x2d5   :  { %v306_v47 = vsub.f32 %v263_v22, %v304_v43 }
 0x2f6   :  { %v238_v44 = vpop.permute.xlu0 %237  ;;  %v256_v48 = vpop.permute.xlu1 %255 }
 0x2f7   :  { %v245_v45 = vmul.f32 %v243_v12, %v238_v44 }
 0x2f9   :  { %v247_v46 = vsub.f32 %v204_v34, %v245_v45 }
 0x2fb   :  { %v259_v49 = vsel %vm229_vm12, %v256_v48, %v247_v46  ;;  %v311_v50 = vpop.permute.xlu0 %310  ;;  %vm457_vm12 = vcmp.gt.s32.totalorder %v1337_v26, 5 }
 0x2fc   :  { %261 = vst.msk [vmem:[#allocation2 + $0x8] sm:$0xff] %vm139_vm4, %v259_v49  ;;  %v318_v51 = vsel %vm289_vm0, %v311_v50, %v306_v47 }
 0x2fd   :  { %320 = vst.msk [vmem:[#allocation2] sm:$0xff] %vm139_vm4, %v318_v51 }
 0x303   :  { %v264_v52 = vld [vmem:[#allocation2 + $0x8] sm:$0xff] }
 0x304   :  { %v322_v53 = vld [vmem:[#allocation2 + $0x3] sm:$0x1]  ;;  %v272_v54 = vmul.f32 %v270_v21, %v264_v52 }
 0x305   :  { %v325_v55 = vmax.f32 %v322_v53, 1e-20  ;;  %v323_v58 = vld [vmem:[#allocation2] sm:$0xff] }
 0x306   :  { %297 = vperm.xlu1 %1173, %v272_v54  }
 0x307   :  { %1229 = vrsqrt.f32 %v325_v55 }
 0x30a   :  { %315 = vperm.xlu1 %1173, %v272_v54  }
 0x30e   :  { %1175 = vset.pattern.permute.xlu1 %v1283_v37 }
 0x311   :  { %v1230_v56 = vpop.eup %1229 }
 0x312   :  { %340 = vperm.xlu0 %1174, %v1230_v56   ;;  %v330_v57 = vrot.slane %v1230_v56, %v1344_v33 }
 0x314   :  { %v331_v59 = vmul.f32 %v330_v57, %v323_v58 }
 0x316   :  { %v335_v60 = vsel %vm333_vm1, %v331_v59, 0.0  ;;  %v347_v61 = vsel %vm345_vm2, %v331_v59, 0.0  ;;  %vm529_vm1 = vcmp.eq.s32.totalorder %v1337_v26, 6  ;;  %vm577_vm2 = vcmp.gt.s32.totalorder %v1337_v26, 7 }
 0x317   :  { %352 = vperm.xlu1 %1175, %v335_v60   ;;  %v1286_v60 = vmov 6  }
 0x31b   :  { %370 = vperm.xlu1 %1175, %v347_v61  }
 0x385   :  { %v298_v62 = vpop.permute.xlu1 %297 }
 0x386   :  { %v305_v63 = vmul.f32 %v303_v41, %v298_v62 }
 0x388   :  { %v307_v0 = vsub.f32 %v264_v52, %v305_v63 }
 0x389   :  { %v316_v1 = vpop.permute.xlu1 %315 }
 0x38a   :  { %v319_v3 = vsel %vm289_vm0, %v316_v1, %v307_v0  ;;  %vm517_vm0 = vcmp.gt.s32.totalorder %v1337_v26, 6 }
 0x38b   :  { %321 = vst.msk [vmem:[#allocation2 + $0x8] sm:$0xff] %vm139_vm4, %v319_v3 }
 0x391   :  { %v341_v4 = vpop.permute.xlu0 %340 }
 0x392   :  { %v343_v5 = vmul.f32 %v341_v4, %v322_v53  ;;  %v324_v6 = vld [vmem:[#allocation2 + $0x8] sm:$0xff] }
 0x393   :  { %v332_v7 = vmul.f32 %v330_v57, %v324_v6 }
 0x394   :  { %v344_v8 = vsel %vm337_vm3, %v343_v5, 0.0  ;;  %vm589_vm3 = vcmp.eq.s32.totalorder %v1337_v26, 7 }
 0x395   :  { %375 = vperm.xlu1 %1175, %v332_v7   ;;  %357 = vperm.xlu0 %1174, %v332_v7   ;;  %v363_v9 = vrot.slane %v344_v8, %v1344_v33 }
 0x396   :  { %v353_v10 = vpop.permute.xlu1 %352 }
 0x397   :  { %v364_v11 = vmul.f32 %v363_v9, %v353_v10 }
 0x399   :  { %v366_v12 = vsub.f32 %v323_v58, %v364_v11  ;;  %1176 = vset.pattern.permute.xlu0 %v1284_v13  ;;  %1177 = vset.pattern.permute.xlu1 %v1284_v13 }
 0x39a   :  { %v371_v14 = vpop.permute.xlu1 %370 }
 0x39b   :  { %v378_v15 = vsel %vm349_vm5, %v371_v14, %v366_v12 }
 0x39c   :  { %380 = vst.msk [vmem:[#allocation2] sm:$0xff] %vm139_vm4, %v378_v15 }
 0x3a3   :  { %v382_v16 = vld [vmem:[#allocation2 + $0x4] sm:$0x1] }
 0x3a4   :  { %v385_v17 = vmax.f32 %v382_v16, 1e-20  ;;  %v383_v20 = vld [vmem:[#allocation2] sm:$0xff] }
 0x3a6   :  { %1231 = vrsqrt.f32 %v385_v17 }
 0x3b0   :  { %v1232_v18 = vpop.eup %1231 }
 0x3b1   :  { %400 = vperm.xlu0 %1176, %v1232_v18   ;;  %v390_v19 = vrot.slane %v1232_v18, %v1344_v33 }
 0x3b3   :  { %v391_v21 = vmul.f32 %v390_v19, %v383_v20 }
 0x3b5   :  { %v395_v22 = vsel %vm393_vm6, %v391_v21, 0.0  ;;  %v407_v23 = vsel %vm405_vm7, %v391_v21, 0.0  ;;  %vm637_vm6 = vcmp.gt.s32.totalorder %v1337_v26, 8  ;;  %vm649_vm7 = vcmp.eq.s32.totalorder %v1337_v26, 8 }
 0x3b6   :  { %412 = vperm.xlu1 %1177, %v395_v22   ;;  %v1287_v22 = vmov 7  }
 0x3ba   :  { %430 = vperm.xlu1 %1177, %v407_v23  }
 0x414   :  { %v358_v24 = vpop.permute.xlu0 %357  ;;  %v376_v30 = vpop.permute.xlu1 %375 }
 0x415   :  { %v365_v28 = vmul.f32 %v363_v9, %v358_v24 }
 0x417   :  { %v367_v29 = vsub.f32 %v324_v6, %v365_v28 }
 0x419   :  { %v379_v31 = vsel %vm349_vm5, %v376_v30, %v367_v29  ;;  %vm634_vm5 = vcmp.gt.s32.totalorder %v1371_v2, 8 }
 0x41a   :  { %381 = vst.msk [vmem:[#allocation2 + $0x8] sm:$0xff] %vm139_vm4, %v379_v31 }
 0x421   :  { %v384_v32 = vld [vmem:[#allocation2 + $0x8] sm:$0xff] }
 0x422   :  { %v392_v34 = vmul.f32 %v390_v19, %v384_v32 }
 0x424   :  { %435 = vperm.xlu1 %1177, %v392_v34   ;;  %417 = vperm.xlu0 %1176, %v392_v34  }
 0x428   :  { %1178 = vset.pattern.permute.xlu0 %v1285_v35  ;;  %1179 = vset.pattern.permute.xlu1 %v1285_v35 }
 0x430   :  { %v401_v36 = vpop.permute.xlu0 %400 }
 0x431   :  { %v403_v37 = vmul.f32 %v401_v36, %v382_v16 }
 0x433   :  { %v404_v38 = vsel %vm397_vm8, %v403_v37, 0.0  ;;  %vm694_vm8 = vcmp.gt.s32.totalorder %v1371_v2, 9 }
 0x434   :  { %v423_v39 = vrot.slane %v404_v38, %v1344_v33 }
 0x435   :  { %v413_v40 = vpop.permute.xlu1 %412 }
 0x436   :  { %v424_v41 = vmul.f32 %v423_v39, %v413_v40 }
 0x438   :  { %v426_v42 = vsub.f32 %v383_v20, %v424_v41 }
 0x439   :  { %v431_v43 = vpop.permute.xlu1 %430 }
 0x43a   :  { %v438_v44 = vsel %vm409_vm9, %v431_v43, %v426_v42 }
 0x43b   :  { %440 = vst.msk [vmem:[#allocation2] sm:$0xff] %vm139_vm4, %v438_v44 }
 0x442   :  { %v442_v45 = vld [vmem:[#allocation2 + $0x5] sm:$0x1] }
 0x443   :  { %v445_v46 = vmax.f32 %v442_v45, 1e-20  ;;  %v443_v49 = vld [vmem:[#allocation2] sm:$0xff] }
 0x445   :  { %1233 = vrsqrt.f32 %v445_v46 }
 0x44f   :  { %v1234_v47 = vpop.eup %1233 }
 0x450   :  { %460 = vperm.xlu0 %1178, %v1234_v47   ;;  %v450_v48 = vrot.slane %v1234_v47, %v1344_v33  ;;  %v1288_v47 = vmov 8  }
 0x452   :  { %v451_v50 = vmul.f32 %v450_v48, %v443_v49 }
 0x454   :  { %v455_v51 = vsel %vm453_vm10, %v451_v50, 0.0  ;;  %v467_v52 = vsel %vm465_vm11, %v451_v50, 0.0  ;;  %vm697_vm10 = vcmp.gt.s32.totalorder %v1337_v26, 9  ;;  %vm709_vm11 = vcmp.eq.s32.totalorder %v1337_v26, 9 }
 0x455   :  { %472 = vperm.xlu1 %1179, %v455_v51  }
 0x459   :  { %490 = vperm.xlu1 %1179, %v467_v52  }
 0x4a3   :  { %v418_v53 = vpop.permute.xlu0 %417  ;;  %v436_v56 = vpop.permute.xlu1 %435 }
 0x4a4   :  { %v425_v54 = vmul.f32 %v423_v39, %v418_v53 }
 0x4a6   :  { %v427_v55 = vsub.f32 %v384_v32, %v425_v54 }
 0x4a8   :  { %v439_v57 = vsel %vm409_vm9, %v436_v56, %v427_v55  ;;  %vm706_vm9 = vcmp.ge.s32.totalorder %v1371_v2, 9 }
 0x4a9   :  { %441 = vst.msk [vmem:[#allocation2 + $0x8] sm:$0xff] %vm139_vm4, %v439_v57 }
 0x4b0   :  { %v444_v58 = vld [vmem:[#allocation2 + $0x8] sm:$0xff] }
 0x4b1   :  { %v452_v59 = vmul.f32 %v450_v48, %v444_v58 }
 0x4b3   :  { %495 = vperm.xlu1 %1179, %v452_v59   ;;  %477 = vperm.xlu0 %1178, %v452_v59  }
 0x4b7   :  { %1180 = vset.pattern.permute.xlu0 %v1286_v60  ;;  %1181 = vset.pattern.permute.xlu1 %v1286_v60 }
 0x4cf   :  { %v461_v61 = vpop.permute.xlu0 %460 }
 0x4d0   :  { %v463_v62 = vmul.f32 %v461_v61, %v442_v45 }
 0x4d2   :  { %v464_v63 = vsel %vm457_vm12, %v463_v62, 0.0  ;;  %vm754_vm12 = vcmp.gt.s32.totalorder %v1371_v2, 10 }
 0x4d3   :  { %v483_v0 = vrot.slane %v464_v63, %v1344_v33 }
 0x4d4   :  { %v473_v1 = vpop.permute.xlu1 %472 }
 0x4d5   :  { %v484_v3 = vmul.f32 %v483_v0, %v473_v1 }
 0x4d7   :  { %v486_v4 = vsub.f32 %v443_v49, %v484_v3 }
 0x4d8   :  { %v491_v5 = vpop.permute.xlu1 %490 }
 0x4d9   :  { %v498_v6 = vsel %vm469_vm13, %v491_v5, %v486_v4 }
 0x4da   :  { %500 = vst.msk [vmem:[#allocation2] sm:$0xff] %vm139_vm4, %v498_v6 }
 0x4e1   :  { %v502_v7 = vld [vmem:[#allocation2 + $0x6] sm:$0x1] }
 0x4e2   :  { %v505_v8 = vmax.f32 %v502_v7, 1e-20  ;;  %v503_v11 = vld [vmem:[#allocation2] sm:$0xff] }
 0x4e4   :  { %1235 = vrsqrt.f32 %v505_v8 }
 0x4ee   :  { %v1236_v9 = vpop.eup %1235 }
 0x4ef   :  { %520 = vperm.xlu0 %1180, %v1236_v9   ;;  %v510_v10 = vrot.slane %v1236_v9, %v1344_v33 }
 0x4f1   :  { %v511_v12 = vmul.f32 %v510_v10, %v503_v11 }
 0x4f3   :  { %v515_v13 = vsel %vm513_vm14, %v511_v12, 0.0  ;;  %v527_v14 = vsel %vm525_vm15, %v511_v12, 0.0  ;;  %vm757_vm14 = vcmp.gt.s32.totalorder %v1337_v26, 10  ;;  %vm769_vm15 = vcmp.eq.s32.totalorder %v1337_v26, 10 }
 0x4f4   :  { %532 = vperm.xlu1 %1181, %v515_v13  }
 0x4f8   :  { %550 = vperm.xlu1 %1181, %v527_v14  }
 0x532   :  { %v478_v15 = vpop.permute.xlu0 %477  ;;  %v496_v18 = vpop.permute.xlu1 %495 }
 0x533   :  { %v485_v16 = vmul.f32 %v483_v0, %v478_v15  ;;  %v1289_v0 = vmov 9  }
 0x535   :  { %v487_v17 = vsub.f32 %v444_v58, %v485_v16 }
 0x537   :  { %v499_v19 = vsel %vm469_vm13, %v496_v18, %v487_v17  ;;  %vm766_vm13 = vcmp.ge.s32.totalorder %v1371_v2, 10 }
 0x538   :  { %501 = vst.msk [vmem:[#allocation2 + $0x8] sm:$0xff] %vm139_vm4, %v499_v19  ;;  %v1290_v19 = vmov 10  }
 0x53f   :  { %v504_v20 = vld [vmem:[#allocation2 + $0x8] sm:$0xff] }
 0x540   :  { %v512_v21 = vmul.f32 %v510_v10, %v504_v20 }
 0x542   :  { %555 = vperm.xlu1 %1181, %v512_v21   ;;  %537 = vperm.xlu0 %1180, %v512_v21  }
 0x546   :  { %1182 = vset.pattern.permute.xlu0 %v1287_v22  ;;  %1183 = vset.pattern.permute.xlu1 %v1287_v22 }
 0x56e   :  { %v521_v23 = vpop.permute.xlu0 %520 }
 0x56f   :  { %v523_v24 = vmul.f32 %v521_v23, %v502_v7 }
 0x571   :  { %v524_v28 = vsel %vm517_vm0, %v523_v24, 0.0  ;;  %vm814_vm0 = vcmp.gt.s32.totalorder %v1371_v2, 11 }
 0x572   :  { %v543_v29 = vrot.slane %v524_v28, %v1344_v33 }
 0x573   :  { %v533_v30 = vpop.permute.xlu1 %532 }
 0x574   :  { %v544_v31 = vmul.f32 %v543_v29, %v533_v30 }
 0x576   :  { %v546_v32 = vsub.f32 %v503_v11, %v544_v31 }
 0x577   :  { %v551_v34 = vpop.permute.xlu1 %550 }
 0x578   :  { %v558_v35 = vsel %vm529_vm1, %v551_v34, %v546_v32 }
 0x579   :  { %560 = vst.msk [vmem:[#allocation2] sm:$0xff] %vm139_vm4, %v558_v35 }
 0x580   :  { %v562_v36 = vld [vmem:[#allocation2 + $0x7] sm:$0x1] }
 0x581   :  { %v565_v37 = vmax.f32 %v562_v36, 1e-20 }
 0x583   :  { %1237 = vrsqrt.f32 %v565_v37 }
 0x58d   :  { %v1238_v38 = vpop.eup %1237 }
 0x58e   :  { %580 = vperm.xlu0 %1182, %v1238_v38   ;;  %v1452_v44 = vrot.slane %v1238_v38, %v1344_v33 }
 0x592   :  { %1184 = vset.pattern.permute.xlu0 %v1288_v47 }
 0x5c1   :  { %v538_v39 = vpop.permute.xlu0 %537  ;;  %v556_v42 = vpop.permute.xlu1 %555 }
 0x5c2   :  { %v545_v40 = vmul.f32 %v543_v29, %v538_v39 }
 0x5c4   :  { %v547_v41 = vsub.f32 %v504_v20, %v545_v40 }
 0x5c6   :  { %v559_v43 = vsel %vm529_vm1, %v556_v42, %v547_v41  ;;  %v1291_v42 = vmov 11   ;;  %vm826_vm1 = vcmp.ge.s32.totalorder %v1371_v2, 11 }
 0x5c7   :  { %561 = vst.msk [vmem:[#allocation2 + $0x8] sm:$0xff] %vm139_vm4, %v559_v43 }
 0x5ce   :  { %v564_v45 = vld [vmem:[#allocation2 + $0x8] sm:$0xff] }
 0x5cf   :  { %v572_v46 = vmul.f32 %v1452_v44, %v564_v45 }
 0x5d1   :  { %597 = vperm.xlu1 %1183, %v572_v46  }
 0x5d5   :  { %615 = vperm.xlu1 %1183, %v572_v46  }
 0x5d9   :  { %1185 = vset.pattern.permute.xlu1 %v1288_v47 }
 0x60d   :  { %v581_v48 = vpop.permute.xlu0 %580 }
 0x60e   :  { %v583_v49 = vmul.f32 %v581_v48, %v562_v36 }
 0x610   :  { %v584_v50 = vsel %vm577_vm2, %v583_v49, 0.0  ;;  %vm817_vm2 = vcmp.gt.s32.totalorder %v1337_v26, 11 }
 0x611   :  { %v1459_v51 = vrot.slane %v584_v50, %v1344_v33 }
 0x650   :  { %v598_v52 = vpop.permute.xlu1 %597 }
 0x651   :  { %v605_v53 = vmul.f32 %v1459_v51, %v598_v52 }
 0x653   :  { %v607_v54 = vsub.f32 %v564_v45, %v605_v53 }
 0x654   :  { %v616_v55 = vpop.permute.xlu1 %615 }
 0x655   :  { %v619_v56 = vsel %vm589_vm3, %v616_v55, %v607_v54 }
 0x656   :  { %621 = vst.msk [vmem:[#allocation2 + $0x8] sm:$0xff] %vm139_vm4, %v619_v56 }
 0x65d   :  { %v622_v57 = vld [vmem:[#allocation2 + $0x8] sm:$0x1] }
 0x65e   :  { %v625_v58 = vmax.f32 %v622_v57, 1e-20  ;;  %v624_v61 = vld [vmem:[#allocation2 + $0x8] sm:$0xff] }
 0x660   :  { %1239 = vrsqrt.f32 %v625_v58 }
 0x66a   :  { %v1240_v59 = vpop.eup %1239 }
 0x66b   :  { %640 = vperm.xlu0 %1184, %v1240_v59   ;;  %v630_v60 = vrot.slane %v1240_v59, %v1344_v33 }
 0x66d   :  { %v632_v62 = vmul.f32 %v630_v60, %v624_v61 }
 0x66f   :  { %v636_v63 = vsel %vm634_vm5, %v632_v62, 0.0  ;;  %1186 = vset.pattern.permute.xlu0 %v1289_v0  ;;  %vm829_vm5 = vcmp.eq.s32.totalorder %v1337_v26, 11 }
 0x670   :  { %657 = vperm.xlu1 %1185, %v636_v63   ;;  %v1292_v63 = vmov 12  }
 0x674   :  { %675 = vperm.xlu1 %1185, %v632_v62  }
 0x678   :  { %1187 = vset.pattern.permute.xlu1 %v1289_v0 }
 0x6ea   :  { %v641_v1 = vpop.permute.xlu0 %640 }
 0x6eb   :  { %v643_v3 = vmul.f32 %v641_v1, %v622_v57 }
 0x6ed   :  { %v644_v4 = vsel %vm637_vm6, %v643_v3, 0.0  ;;  %vm874_vm6 = vcmp.gt.s32.totalorder %v1371_v2, 12 }
 0x6ee   :  { %v1472_v5 = vrot.slane %v644_v4, %v1344_v33 }
 0x6ef   :  { %v658_v6 = vpop.permute.xlu1 %657 }
 0x6f0   :  { %v665_v7 = vmul.f32 %v1472_v5, %v658_v6 }
 0x6f2   :  { %v667_v8 = vsub.f32 %v624_v61, %v665_v7 }
 0x6f3   :  { %v676_v9 = vpop.permute.xlu1 %675 }
 0x6f4   :  { %v679_v10 = vsel %vm649_vm7, %v676_v9, %v667_v8 }
 0x6f5   :  { %681 = vst.msk [vmem:[#allocation2 + $0x8] sm:$0xff] %vm139_vm4, %v679_v10 }
 0x6fc   :  { %v682_v11 = vld [vmem:[#allocation2 + $0x9] sm:$0x1] }
 0x6fd   :  { %v685_v12 = vmax.f32 %v682_v11, 1e-20  ;;  %v684_v15 = vld [vmem:[#allocation2 + $0x8] sm:$0xff] }
 0x6ff   :  { %1241 = vrsqrt.f32 %v685_v12 }
 0x709   :  { %v1242_v13 = vpop.eup %1241 }
 0x70a   :  { %700 = vperm.xlu0 %1186, %v1242_v13   ;;  %v690_v14 = vrot.slane %v1242_v13, %v1344_v33 }
 0x70c   :  { %v692_v16 = vmul.f32 %v690_v14, %v684_v15 }
 0x70e   :  { %v696_v17 = vsel %vm694_vm8, %v692_v16, 0.0  ;;  %v708_v18 = vsel %vm706_vm9, %v692_v16, 0.0  ;;  %1188 = vset.pattern.permute.xlu0 %v1290_v19  ;;  %vm886_vm8 = vcmp.ge.s32.totalorder %v1371_v2, 12  ;;  %vm877_vm9 = vcmp.gt.s32.totalorder %v1337_v26, 12 }
 0x70f   :  { %717 = vperm.xlu1 %1187, %v696_v17  }
 0x713   :  { %735 = vperm.xlu1 %1187, %v708_v18  }
 0x717   :  { %1189 = vset.pattern.permute.xlu1 %v1290_v19 }
 0x789   :  { %v701_v20 = vpop.permute.xlu0 %700 }
 0x78a   :  { %v703_v21 = vmul.f32 %v701_v20, %v682_v11 }
 0x78c   :  { %v704_v23 = vsel %vm697_vm10, %v703_v21, 0.0  ;;  %v1293_v21 = vmov 13   ;;  %vm889_vm10 = vcmp.eq.s32.totalorder %v1337_v26, 12 }
 0x78d   :  { %v1486_v24 = vrot.slane %v704_v23, %v1344_v33 }
 0x78e   :  { %v718_v28 = vpop.permute.xlu1 %717 }
 0x78f   :  { %v725_v29 = vmul.f32 %v1486_v24, %v718_v28 }
 0x791   :  { %v727_v30 = vsub.f32 %v684_v15, %v725_v29 }
 0x792   :  { %v736_v31 = vpop.permute.xlu1 %735 }
 0x793   :  { %v739_v32 = vsel %vm709_vm11, %v736_v31, %v727_v30 }
 0x794   :  { %741 = vst.msk [vmem:[#allocation2 + $0x8] sm:$0xff] %vm139_vm4, %v739_v32 }
 0x79b   :  { %v742_v34 = vld [vmem:[#allocation2 + $0xa] sm:$0x1] }
 0x79c   :  { %v745_v35 = vmax.f32 %v742_v34, 1e-20  ;;  %v744_v38 = vld [vmem:[#allocation2 + $0x8] sm:$0xff] }
 0x79e   :  { %1243 = vrsqrt.f32 %v745_v35 }
 0x7a8   :  { %v1244_v36 = vpop.eup %1243 }
 0x7a9   :  { %760 = vperm.xlu0 %1188, %v1244_v36   ;;  %v750_v37 = vrot.slane %v1244_v36, %v1344_v33 }
 0x7ab   :  { %v752_v39 = vmul.f32 %v750_v37, %v744_v38 }
 0x7ad   :  { %v756_v40 = vsel %vm754_vm12, %v752_v39, 0.0  ;;  %v768_v41 = vsel %vm766_vm13, %v752_v39, 0.0  ;;  %1190 = vset.pattern.permute.xlu0 %v1291_v42  ;;  %vm934_vm12 = vcmp.gt.s32.totalorder %v1371_v2, 13  ;;  %vm946_vm13 = vcmp.ge.s32.totalorder %v1371_v2, 13 }
 0x7ae   :  { %777 = vperm.xlu1 %1189, %v756_v40  }
 0x7b2   :  { %795 = vperm.xlu1 %1189, %v768_v41  }
 0x7b6   :  { %1191 = vset.pattern.permute.xlu1 %v1291_v42 }
 0x828   :  { %v761_v43 = vpop.permute.xlu0 %760 }
 0x829   :  { %v763_v45 = vmul.f32 %v761_v43, %v742_v34 }
 0x82b   :  { %v764_v46 = vsel %vm757_vm14, %v763_v45, 0.0  ;;  %vm937_vm14 = vcmp.gt.s32.totalorder %v1337_v26, 13 }
 0x82c   :  { %v1500_v48 = vrot.slane %v764_v46, %v1344_v33 }
 0x82d   :  { %v778_v49 = vpop.permute.xlu1 %777 }
 0x82e   :  { %v785_v50 = vmul.f32 %v1500_v48, %v778_v49  ;;  %v1294_v49 = vmov 14  }
 0x830   :  { %v787_v52 = vsub.f32 %v744_v38, %v785_v50 }
 0x831   :  { %v796_v53 = vpop.permute.xlu1 %795 }
 0x832   :  { %v799_v54 = vsel %vm769_vm15, %v796_v53, %v787_v52 }
 0x833   :  { %801 = vst.msk [vmem:[#allocation2 + $0x8] sm:$0xff] %vm139_vm4, %v799_v54 }
 0x83a   :  { %v802_v55 = vld [vmem:[#allocation2 + $0xb] sm:$0x1] }
 0x83b   :  { %v805_v56 = vmax.f32 %v802_v55, 1e-20  ;;  %v804_v59 = vld [vmem:[#allocation2 + $0x8] sm:$0xff] }
 0x83d   :  { %1245 = vrsqrt.f32 %v805_v56 }
 0x847   :  { %v1246_v57 = vpop.eup %1245 }
 0x848   :  { %820 = vperm.xlu0 %1190, %v1246_v57   ;;  %v810_v58 = vrot.slane %v1246_v57, %v1344_v33 }
 0x84a   :  { %v812_v60 = vmul.f32 %v810_v58, %v804_v59 }
 0x84c   :  { %v816_v61 = vsel %vm814_vm0, %v812_v60, 0.0  ;;  %v828_v62 = vsel %vm826_vm1, %v812_v60, 0.0  ;;  %1192 = vset.pattern.permute.xlu0 %v1292_v63  ;;  %vm949_vm0 = vcmp.eq.s32.totalorder %v1337_v26, 13  ;;  %vm994_vm1 = vcmp.gt.s32.totalorder %v1371_v2, 14 }
 0x84d   :  { %837 = vperm.xlu1 %1191, %v816_v61  }
 0x851   :  { %855 = vperm.xlu1 %1191, %v828_v62  }
 0x855   :  { %1193 = vset.pattern.permute.xlu1 %v1292_v63 }
 0x8c7   :  { %v821_v1 = vpop.permute.xlu0 %820 }
 0x8c8   :  { %v823_v3 = vmul.f32 %v821_v1, %v802_v55 }
 0x8ca   :  { %v824_v4 = vsel %vm817_vm2, %v823_v3, 0.0  ;;  %vm1006_vm2 = vcmp.ge.s32.totalorder %v1371_v2, 14 }
 0x8cb   :  { %v1514_v6 = vrot.slane %v824_v4, %v1344_v33 }
 0x8cc   :  { %v838_v7 = vpop.permute.xlu1 %837 }
 0x8cd   :  { %v845_v8 = vmul.f32 %v1514_v6, %v838_v7 }
 0x8cf   :  { %v847_v9 = vsub.f32 %v804_v59, %v845_v8 }
 0x8d0   :  { %v856_v10 = vpop.permute.xlu1 %855 }
 0x8d1   :  { %v859_v11 = vsel %vm829_vm5, %v856_v10, %v847_v9  ;;  %v563_v9 = vld [vmem:[#allocation2] sm:$0xff] }
 0x8d2   :  { %861 = vst.msk [vmem:[#allocation2 + $0x8] sm:$0xff] %vm139_vm4, %v859_v11  ;;  %v571_v10 = vmul.f32 %v1452_v44, %v563_v9 }
 0x8d9   :  { %v862_v12 = vld [vmem:[#allocation2 + $0xc] sm:$0x1] }
 0x8da   :  { %v865_v13 = vmax.f32 %v862_v12, 1e-20  ;;  %v864_v16 = vld [vmem:[#allocation2 + $0x8] sm:$0xff] }
 0x8dc   :  { %1247 = vrsqrt.f32 %v865_v13 }
 0x8e6   :  { %v1248_v14 = vpop.eup %1247 }
 0x8e7   :  { %880 = vperm.xlu0 %1192, %v1248_v14   ;;  %v870_v15 = vrot.slane %v1248_v14, %v1344_v33 }
 0x8e9   :  { %v872_v17 = vmul.f32 %v870_v15, %v864_v16 }
 0x8eb   :  { %v876_v18 = vsel %vm874_vm6, %v872_v17, 0.0  ;;  %v888_v20 = vsel %vm886_vm8, %v872_v17, 0.0  ;;  %1194 = vset.pattern.permute.xlu0 %v1293_v21  ;;  %vm585_vm6 = vcmp.ge.s32.totalorder %v1335_v25, 7  ;;  %v1295_v25 = vmov 15  }
 0x8ec   :  { %897 = vperm.xlu1 %1193, %v876_v18   ;;  %v587_v11 = vsel %vm585_vm6, %v571_v10, 0.0  ;;  %vm997_vm8 = vcmp.gt.s32.totalorder %v1337_v26, 14 }
 0x8f0   :  { %915 = vperm.xlu1 %1193, %v888_v20  }
 0x8f4   :  { %1195 = vset.pattern.permute.xlu1 %v1293_v21 }
 0x966   :  { %v881_v23 = vpop.permute.xlu0 %880 }
 0x967   :  { %v883_v28 = vmul.f32 %v881_v23, %v862_v12 }
 0x969   :  { %v884_v29 = vsel %vm877_vm9, %v883_v28, 0.0  ;;  %vm1009_vm9 = vcmp.eq.s32.totalorder %v1337_v26, 14 }
 0x96a   :  { %v1528_v30 = vrot.slane %v884_v29, %v1344_v33 }
 0x96b   :  { %v898_v31 = vpop.permute.xlu1 %897 }
 0x96c   :  { %v905_v32 = vmul.f32 %v1528_v30, %v898_v31 }
 0x96e   :  { %v907_v34 = vsub.f32 %v864_v16, %v905_v32 }
 0x96f   :  { %v916_v35 = vpop.permute.xlu1 %915 }
 0x970   :  { %v919_v36 = vsel %vm889_vm10, %v916_v35, %v907_v34 }
 0x971   :  { %921 = vst.msk [vmem:[#allocation2 + $0x8] sm:$0xff] %vm139_vm4, %v919_v36 }
 0x978   :  { %v922_v37 = vld [vmem:[#allocation2 + $0xd] sm:$0x1] }
 0x979   :  { %v925_v38 = vmax.f32 %v922_v37, 1e-20  ;;  %v924_v41 = vld [vmem:[#allocation2 + $0x8] sm:$0xff] }
 0x97b   :  { %1249 = vrsqrt.f32 %v925_v38 }
 0x985   :  { %v1250_v39 = vpop.eup %1249 }
 0x986   :  { %940 = vperm.xlu0 %1194, %v1250_v39   ;;  %v930_v40 = vrot.slane %v1250_v39, %v1344_v33 }
 0x988   :  { %v932_v43 = vmul.f32 %v930_v40, %v924_v41 }
 0x98a   :  { %v936_v45 = vsel %vm934_vm12, %v932_v43, 0.0  ;;  %v948_v46 = vsel %vm946_vm13, %v932_v43, 0.0  ;;  %1196 = vset.pattern.permute.xlu0 %v1294_v49 }
 0x98b   :  { %957 = vperm.xlu1 %1195, %v936_v45  }
 0x98f   :  { %975 = vperm.xlu1 %1195, %v948_v46  }
 0x993   :  { %1197 = vset.pattern.permute.xlu1 %v1294_v49 }
 0xa05   :  { %v941_v50 = vpop.permute.xlu0 %940 }
 0xa06   :  { %v943_v52 = vmul.f32 %v941_v50, %v922_v37 }
 0xa08   :  { %v944_v53 = vsel %vm937_vm14, %v943_v52, 0.0 }
 0xa09   :  { %v1542_v54 = vrot.slane %v944_v53, %v1344_v33 }
 0xa0a   :  { %v958_v55 = vpop.permute.xlu1 %957 }
 0xa0b   :  { %v965_v56 = vmul.f32 %v1542_v54, %v958_v55 }
 0xa0d   :  { %v967_v57 = vsub.f32 %v924_v41, %v965_v56 }
 0xa0e   :  { %v976_v58 = vpop.permute.xlu1 %975 }
 0xa0f   :  { %v979_v59 = vsel %vm949_vm0, %v976_v58, %v967_v57 }
 0xa10   :  { %981 = vst.msk [vmem:[#allocation2 + $0x8] sm:$0xff] %vm139_vm4, %v979_v59 }
 0xa17   :  { %v982_v60 = vld [vmem:[#allocation2 + $0xe] sm:$0x1] }
 0xa18   :  { %v985_v61 = vmax.f32 %v982_v60, 1e-20  ;;  %v984_v3 = vld [vmem:[#allocation2 + $0x8] sm:$0xff] }
 0xa1a   :  { %1251 = vrsqrt.f32 %v985_v61 }
 0xa24   :  { %v1252_v62 = vpop.eup %1251 }
 0xa25   :  { %1000 = vperm.xlu0 %1196, %v1252_v62   ;;  %v990_v1 = vrot.slane %v1252_v62, %v1344_v33 }
 0xa27   :  { %v992_v4 = vmul.f32 %v990_v1, %v984_v3 }
 0xa29   :  { %1198 = vset.pattern.permute.xlu0 %v1287_v22  ;;  %v996_v7 = vsel %vm994_vm1, %v992_v4, 0.0  ;;  %v1008_v8 = vsel %vm1006_vm2, %v992_v4, 0.0 }
 0xa2a   :  { %592 = vperm.xlu0 %1198, %v1280_v27   ;;  %1017 = vperm.xlu1 %1197, %v996_v7  }
 0xa2e   :  { %1201 = vset.pattern.permute.xlu0 %v1288_v47  ;;  %1035 = vperm.xlu1 %1197, %v1008_v8  }
 0xa2f   :  { %670 = vperm.xlu0 %1201, %v1280_v27  }
 0xa32   :  { %1199 = vset.pattern.permute.xlu1 %v1287_v22 }
 0xa33   :  { %1203 = vset.pattern.permute.xlu0 %v1290_v19  ;;  %610 = vperm.xlu1 %1199, %v587_v11  }
 0xa34   :  { %772 = vperm.xlu0 %1203, %v1280_v27  }
 0xa37   :  { %1200 = vset.pattern.permute.xlu1 %v1288_v47 }
 0xa38   :  { %1206 = vset.pattern.permute.xlu0 %v1291_v42  ;;  %652 = vperm.xlu1 %1200, %v1280_v27  }
 0xa39   :  { %850 = vperm.xlu0 %1206, %v1280_v27  }
 0xa3c   :  { %1202 = vset.pattern.permute.xlu1 %v1289_v0 }
 0xa3d   :  { %1208 = vset.pattern.permute.xlu0 %v1293_v21  ;;  %712 = vperm.xlu1 %1202, %v1280_v27  }
 0xa3e   :  { %952 = vperm.xlu0 %1208, %v1280_v27  }
 0xa41   :  { %730 = vperm.xlu1 %1202, %v1280_v27  }
 0xa42   :  { %1211 = vset.pattern.permute.xlu0 %v1294_v49 }
 0xa43   :  { %1030 = vperm.xlu0 %1211, %v1280_v27  }
 0xa45   :  { %1204 = vset.pattern.permute.xlu1 %v1290_v19 }
 0xa46   :  { %790 = vperm.xlu1 %1204, %v1280_v27  }
 0xa47   :  { %1218 = vset.pattern.permute.xlu0 %v1295_v25 }
 0xa48   :  { %1090 = vperm.xlu0 %1218, %v1280_v27  }
 0xa4a   :  { %1205 = vset.pattern.permute.xlu1 %v1291_v42 }
 0xa4b   :  { %832 = vperm.xlu1 %1205, %v1280_v27  }
 0xa4f   :  { %1207 = vset.pattern.permute.xlu1 %v1292_v63 }
 0xa50   :  { %892 = vperm.xlu1 %1207, %v1280_v27  }
 0xa54   :  { %910 = vperm.xlu1 %1207, %v1280_v27  }
 0xa58   :  { %1209 = vset.pattern.permute.xlu1 %v1293_v21 }
 0xa59   :  { %970 = vperm.xlu1 %1209, %v1280_v27  }
 0xa5d   :  { %1210 = vset.pattern.permute.xlu1 %v1294_v49 }
 0xa5e   :  { %1012 = vperm.xlu1 %1210, %v1280_v27  }
 0xa62   :  { %1212 = vset.pattern.permute.xlu1 %v1295_v25 }
 0xaa4   :  { %v1001_v22 = vpop.permute.xlu0 %1000 }
 0xaa5   :  { %v1003_v44 = vmul.f32 %v1001_v22, %v982_v60 }
 0xaa7   :  { %v1004_v47 = vsel %vm997_vm8, %v1003_v44, 0.0 }
 0xaa8   :  { %v1586_v0 = vrot.slane %v1004_v47, %v1344_v33 }
 0xaa9   :  { %v1018_v19 = vpop.permute.xlu1 %1017  ;;  %v593_v42 = vpop.permute.xlu0 %592 }
 0xaaa   :  { %v1025_v63 = vmul.f32 %v1586_v0, %v1018_v19  ;;  %v604_v13 = vmul.f32 %v1459_v51, %v593_v42 }
 0xaac   :  { %v1027_v12 = vsub.f32 %v984_v3, %v1025_v63  ;;  %v606_v16 = vsub.f32 %v563_v9, %v604_v13 }
 0xaad   :  { %v1036_v14 = vpop.permute.xlu1 %1035 }
 0xaae   :  { %v1039_v15 = vsel %vm1009_vm9, %v1036_v14, %v1027_v12  ;;  %v671_v31 = vpop.permute.xlu0 %670 }
 0xaaf   :  { %1041 = vst.msk [vmem:[#allocation2 + $0x8] sm:$0xff] %vm139_vm4, %v1039_v15 }
 0xab2   :  { %v611_v17 = vpop.permute.xlu1 %610 }
 0xab3   :  { %v618_v18 = vsel %vm589_vm3, %v611_v17, %v606_v16  ;;  %vm1066_vm3 = vcmp.ge.s32.totalorder %v1371_v2, 15  ;;  %v773_v46 = vpop.permute.xlu0 %772 }
 0xab4   :  { %620 = vst.msk [vmem:[#allocation2] sm:$0xff] %vm139_vm4, %v618_v18 }
 0xab6   :  { %v1597_v20 = vld [vmem:[#allocation2 + $0xf] sm:$0x1] }
 0xab7   :  { %v653_v21 = vpop.permute.xlu1 %652  ;;  %v1045_v23 = vmax.f32 %v1597_v20, 1e-20  ;;  %v1606_v39 = vld [vmem:[#allocation2 + $0x8] sm:$0xff] }
 0xab8   :  { %v664_v51 = vmul.f32 %v1472_v5, %v653_v21  ;;  %v851_v57 = vpop.permute.xlu0 %850 }
 0xab9   :  { %1253 = vrsqrt.f32 %v1045_v23 }
 0xabb   :  { %v623_v28 = vld [vmem:[#allocation2] sm:$0xff] }
 0xabc   :  { %v666_v29 = vsub.f32 %v623_v28, %v664_v51  ;;  %v713_v34 = vpop.permute.xlu1 %712 }
 0xabd   :  { %v724_v37 = vmul.f32 %v1486_v24, %v713_v34  ;;  %v784_v24 = vmul.f32 %v1500_v48, %v773_v46 }
 0xabe   :  { %v678_v32 = vsel %vm649_vm7, %v671_v31, %v666_v29  ;;  %vm1057_vm7 = vcmp.gt.s32.totalorder %v1337_v26, 15 }
 0xabf   :  { %680 = vst.msk [vmem:[#allocation2] sm:$0xff] %vm139_vm4, %v678_v32 }
 0xac0   :  { %v731_v41 = vpop.permute.xlu1 %730 }
 0xac3   :  { %v1254_v35 = vpop.eup %1253 }
 0xac4   :  { %1060 = vperm.xlu1 %1212, %v1254_v35   ;;  %v1050_v36 = vrot.slane %v1254_v35, %v1344_v33 }
 0xac5   :  { %v791_v52 = vpop.permute.xlu1 %790 }
 0xac6   :  { %v683_v38 = vld [vmem:[#allocation2] sm:$0xff]  ;;  %v1052_v5 = vmul.f32 %v1050_v36, %v1606_v39 }
 0xac7   :  { %v726_v40 = vsub.f32 %v683_v38, %v724_v37 }
 0xac8   :  { %1214 = vperm.xlu1 %1212, %v1280_v27   ;;  %v1068_v45 = vsel %vm1066_vm3, %v1052_v5, 0.0 }
 0xac9   :  { %v738_v43 = vsel %vm709_vm11, %v731_v41, %v726_v40  ;;  %vm1069_vm11 = vcmp.eq.s32.totalorder %v1337_v26, 15 }
 0xaca   :  { %740 = vst.msk [vmem:[#allocation2] sm:$0xff] %vm139_vm4, %v738_v43  ;;  %v833_v27 = vpop.permute.xlu1 %832 }
 0xacb   :  { %v844_v2 = vmul.f32 %v1514_v6, %v833_v27  ;;  %v953_v6 = vpop.permute.xlu0 %952 }
 0xacc   :  { %1095 = vperm.xlu1 %1212, %v1068_v45   ;;  %v964_v3 = vmul.f32 %v1542_v54, %v953_v6 }
 0xacf   :  { %v893_v48 = vpop.permute.xlu1 %892  ;;  %v1031_v25 = vpop.permute.xlu0 %1030 }
 0xad0   :  { %v904_v59 = vmul.f32 %v1528_v30, %v893_v48 }
 0xad1   :  { %v743_v49 = vld [vmem:[#allocation2] sm:$0xff] }
 0xad2   :  { %v786_v50 = vsub.f32 %v743_v49, %v784_v24 }
 0xad3   :  { %v911_v62 = vpop.permute.xlu1 %910  ;;  %v1091_v16 = vpop.permute.xlu0 %1090 }
 0xad4   :  { %v798_v53 = vsel %vm769_vm15, %v791_v52, %v786_v50 }
 0xad5   :  { %800 = vst.msk [vmem:[#allocation2] sm:$0xff] %vm139_vm4, %v798_v53 }
 0xad8   :  { %v971_v8 = vpop.permute.xlu1 %970 }
 0xadc   :  { %v803_v55 = vld [vmem:[#allocation2] sm:$0xff] }
 0xadd   :  { %v846_v56 = vsub.f32 %v803_v55, %v844_v2  ;;  %v1013_v30 = vpop.permute.xlu1 %1012 }
 0xade   :  { %v1024_v10 = vmul.f32 %v1586_v0, %v1013_v30 }
 0xadf   :  { %v858_v58 = vsel %vm829_vm5, %v851_v57, %v846_v56 }
 0xae0   :  { %860 = vst.msk [vmem:[#allocation2] sm:$0xff] %vm139_vm4, %v858_v58 }
 0xae7   :  { %v863_v60 = vld [vmem:[#allocation2] sm:$0xff] }
 0xae8   :  { %v906_v61 = vsub.f32 %v863_v60, %v904_v59 }
 0xaea   :  { %v918_v1 = vsel %vm889_vm10, %v911_v62, %v906_v61 }
 0xaeb   :  { %920 = vst.msk [vmem:[#allocation2] sm:$0xff] %vm139_vm4, %v918_v1 }
 0xaf2   :  { %v923_v4 = vld [vmem:[#allocation2] sm:$0xff] }
 0xaf3   :  { %v966_v7 = vsub.f32 %v923_v4, %v964_v3 }
 0xaf5   :  { %v978_v9 = vsel %vm949_vm0, %v971_v8, %v966_v7 }
 0xaf6   :  { %980 = vst.msk [vmem:[#allocation2] sm:$0xff] %vm139_vm4, %v978_v9 }
 0xafd   :  { %v983_v11 = vld [vmem:[#allocation2] sm:$0xff] }
 0xafe   :  { %v1026_v22 = vsub.f32 %v983_v11, %v1024_v10 }
 0xb00   :  { %v1038_v44 = vsel %vm1009_vm9, %v1031_v25, %v1026_v22 }
 0xb01   :  { %1040 = vst.msk [vmem:[#allocation2] sm:$0xff] %vm139_vm4, %v1038_v44 }
 0xb08   :  { %v1043_v15 = vld [vmem:[#allocation2] sm:$0xff] }
 0xb43   :  { %v1061_v54 = vpop.permute.xlu1 %1060 }
 0xb44   :  { %v1063_v47 = vmul.f32 %v1061_v54, %v1597_v20 }
 0xb46   :  { %v1064_v19 = vsel %vm1057_vm7, %v1063_v47, 0.0 }
 0xb47   :  { %v1083_v42 = vrot.slane %v1064_v19, %v1344_v33  ;;  %v1215_v63 = vpop.permute.xlu1 %1214 }
 0xb48   :  { %v1217_v12 = vunpack.i.h.bf16 %v1215_v63  ;;  %v1216_v13 = vunpack.i.l.bf16 %v1215_v63 }
 0xb4a   :  { %v1085_v0 = vmul.f32 %v1217_v12, %v1083_v42  ;;  %v1084_v14 = vmul.f32 %v1216_v13, %v1083_v42 }
 0xb4b   :  { %v1096_v21 = vpop.permute.xlu1 %1095 }
 0xb4c   :  { %v1087_v17 = vsub.f32 %v1606_v39, %v1085_v0  ;;  %v1086_v18 = vsub.f32 %v1043_v15, %v1084_v14 }
 0xb4e   :  { %v1099_v23 = vsel %vm1069_vm11, %v1096_v21, %v1087_v17  ;;  %v1098_v51 = vsel %vm1069_vm11, %v1091_v16, %v1086_v18 }
 0xb4f   :  { %1101 = vst.msk [vmem:[#allocation2 + $0x8] sm:$0xff] %vm139_vm4, %v1099_v23  ;;  %1100 = vst.msk [vmem:[#allocation2] sm:$0xff] %vm139_vm4, %v1098_v51 }
 0xb56   :  { %v1102_v33 = vld [vmem:[#allocation2] sm:$0xff]  ;;  %v1103_v20 = vld [vmem:[#allocation2 + $0x8] sm:$0xff] }
 0xb57   :  { %1104 = vst.msk [vmem:[#allocation3] sm:$0xff] %vm139_vm4, %v1102_v33  ;;  %1105 = vst.msk [vmem:[#allocation3 + $0x8] sm:$0xff] %vm139_vm4, %v1103_v20 }
 0xb58   :  { %1266 = shalt.err (!%p1263_p4)
}
 0xb59   :  { %s1267_s18 = scalar_lea.hbm %s1657_s2, 256 }
 0xb5a   :  { %p1268_p5 = scmp.ne.s32.totalorder %s1657_s2, %s1267_s18  ;;  %p1271_p6 = scmp.lt.u32.totalorder %s1267_s18, %s1657_s2 }
 0xb5c   :  { %p1273_p7 = pnand %p1271_p6, %p1268_p5 }
 0xb5e   :  { %1276 = shalt.err (!%p1273_p7)
}
 0xb5f   :  { %s1297_s23 = smov 128   ;;  %s1298_s24 = smov 8  }
 0xb60   :  { %1117 = dma.vmem_to_hbm [thread:$0]  %s1112_s14, 256, %s1657_s2, [#allocation4], %s1297_s23, %s1297_s23, %s1298_s24  }
 0xb61   :  { %1277 = dma.done.wait [#allocation4], 256  }
 0xb62   :  { %1278 = vsyncadd [#allocation4], 4294967040 }
 0xb63   :  { %1121 = vsyncpa [#allocation4], 1 }

</bundles_post_ra>
